<compile_context>
chip_gen: v7x
topology: tpu7x:2x2x1
jax: 0.10.0
libtpu: 0.0.40
codegen_flags: <defaults>
</compile_context>

<pallas_src>
import functools

import jax
import jax.numpy as jnp
from jax import lax
from jax.experimental import pallas as pl
from jax.experimental.pallas import tpu as pltpu

D_EMB = 50     # token-embedding dim (LSTMEncoder dim=50)
H_LSTM = 100   # LSTM hidden dim (hidden_dim default=100)
DP = 128       # padded embedding dim  (lane-dense contraction)
HP = 128       # padded hidden dim     (each gate = exactly one vreg width)
GP = 4 * HP    # padded gate width


def _round_up(x, m):
    return ((x + m - 1) // m) * m


def lstm_batch_kernel(x_ref, w_ih_ref, w_hh_ref, b_ref, out_ref, pre_ref,
                      *, gates_in_bf16):
    """LSTM over a tile of Bt independent stacks.

    x_ref    : (T, Bt, DP)    bf16 time-major, lane-padded embedded sequences
    w_ih_ref : (DP, GP)       bf16 input->gates weights (gates 128-lane aligned)
    w_hh_ref : (HP, GP)       bf16 hidden->gates weights
    b_ref    : (1, GP)        f32 combined bias (b_ih + b_hh), zero in padded lanes
    out_ref  : (Bt, HP)       f32 final hidden state h_T per stack
    pre_ref  : (T, Bt, GP)    f32 VMEM scratch for the hoisted input projection
    """
    T, Bt, Dp = x_ref.shape
    Hp = out_ref.shape[1]
    G = 4 * Hp

    # ---- Hoisted input projection: one big bf16 MXU matmul off the serial chain.
    # Bt % 16 == 0 so merging (T, Bt) leading dims is a free bf16 layout merge.
    x_flat = x_ref[...].reshape(T * Bt, Dp)
    pre_ref[...] = (
        jnp.dot(x_flat, w_ih_ref[...], preferred_element_type=jnp.float32)
        + b_ref[...]
    ).reshape(T, Bt, G)

    w_hh = w_hh_ref[...]                       # bf16, reused every step
    h0 = jnp.zeros((Bt, Hp), jnp.float32)
    c0 = jnp.zeros((Bt, Hp), jnp.float32)

    # ---- Serial recurrence: only h @ W_hh (bf16 MXU) + gate math on the chain.
    # Note: step t+1's matmul depends on step t's tanh/sigmoid, so MXU/EUP overlap
    # across steps is impossible; unrolling only removes loop overhead.  Keeping
    # W_hh resident via pltpu.matmul_push_rhs is the remaining micro-opt (skipped).
    def step(t, carry):
        h, c = carry
        gates = pre_ref[t] + jnp.dot(h.astype(jnp.bfloat16), w_hh,
                                     preferred_element_type=jnp.float32)
        if gates_in_bf16:
            # bf16 EUP path for v6e/v7x; keep False on v5e (no bf16 VPU/EUP).
            gates = gates.astype(jnp.bfloat16)
        i = jax.nn.sigmoid(gates[:, 0 * Hp:1 * Hp])
        f = jax.nn.sigmoid(gates[:, 1 * Hp:2 * Hp])
        g = jnp.tanh(gates[:, 2 * Hp:3 * Hp])
        o = jax.nn.sigmoid(gates[:, 3 * Hp:4 * Hp])
        c_new = (f * c + i * g).astype(jnp.float32)
        h_new = (o * jnp.tanh(c_new)).astype(jnp.float32)
        return (h_new, c_new)

    # Full unroll only while the (Bt, 4*Hp) f32 gates tensor (Bt/2 vregs) leaves
    # headroom in the 64-entry vreg file; rolled loop at MXU-filling Bt.
    unroll = Bt <= 64
    h_final, _ = lax.fori_loop(0, T, step, (h0, c0), unroll=unroll)
    out_ref[...] = h_final


def pad_lstm_params(w_ih, w_hh, b):
    """One-time zero-pad of LSTM params to lane-dense bf16 (DP,GP)/(HP,GP) + f32 bias.

    Each gate (i, f, g, o) lands in its own 128-lane-aligned slot.  Padded W_hh
    rows/columns and padded bias lanes are zero, so padded lanes of h/c stay 0.
    """
    D = w_ih.shape[0]
    H = w_hh.shape[0]
    w_ih_p = jnp.zeros((DP, GP), jnp.bfloat16)
    w_hh_p = jnp.zeros((HP, GP), jnp.bfloat16)
    b_p = jnp.zeros((1, GP), jnp.float32)
    for k in range(4):
        w_ih_p = w_ih_p.at[:D, k * HP:k * HP + H].set(
            w_ih[:, k * H:(k + 1) * H].astype(jnp.bfloat16))
        w_hh_p = w_hh_p.at[:H, k * HP:k * HP + H].set(
            w_hh[:, k * H:(k + 1) * H].astype(jnp.bfloat16))
        b_p = b_p.at[:, k * HP:k * HP + H].set(b[:, k * H:(k + 1) * H])
    return w_ih_p, w_hh_p, b_p


def pad_embedding_table(table):
    """One-time pad of the 'coder' embedding table to (VOCAB, DP) bf16."""
    V, D = table.shape
    return jnp.zeros((V, DP), jnp.bfloat16).at[:, :D].set(table.astype(jnp.bfloat16))


def encode_stacks(token_ids, table_p, w_ih_p, w_hh_p, b_p, *,
                  block_b=None, max_block_b=256, gates_in_bf16=False):
    """Batched StackEncoder forward: (B, T) int token ids -> (B, H) embeddings.

    block_b defaults to min(round_up(B, 16), 256): one grid step for small B
    (no per-step overhead on single-TC v5e/v6e), MXU-M-filling blocks for large B
    while staying inside v7x's 32 MiB scoped VMEM.  The batch grid axis is
    'parallel' so v7x's two TensorCores split multi-block batches.
    """
    B, T = token_ids.shape
    if block_b is None:
        block_b = min(_round_up(B, 16), max_block_b)
    assert block_b % 16 == 0, "block_b must be a multiple of 16 (bf16 sublane packing)"
    Bp = _round_up(B, block_b)

    # Pad the tiny int32 id matrix (not a big f32 tensor) and gather straight from
    # the lane-padded bf16 table in time-major order: (T, Bp, DP), no extra
    # zero-padded x materialization.  Pad ids are 0 (valid row), rows sliced later.
    ids = jnp.zeros((Bp, T), token_ids.dtype).at[:B].set(token_ids)
    x_tm = table_p[ids.T]                                   # (T, Bp, DP) bf16

    kernel = functools.partial(lstm_batch_kernel, gates_in_bf16=gates_in_bf16)
    out = pl.pallas_call(
        kernel,
        out_shape=jax.ShapeDtypeStruct((Bp, HP), jnp.float32),
        grid_spec=pltpu.PrefetchScalarGridSpec(
            num_scalar_prefetch=0,
            grid=(Bp // block_b,),
            in_specs=[
                pl.BlockSpec((T, block_b, DP), lambda i: (0, i, 0)),
                pl.BlockSpec((DP, GP), lambda i: (0, 0)),
                pl.BlockSpec((HP, GP), lambda i: (0, 0)),
                pl.BlockSpec((1, GP), lambda i: (0, 0)),
            ],
            out_specs=pl.BlockSpec((block_b, HP), lambda i: (i, 0)),
            scratch_shapes=[pltpu.VMEM((T, block_b, GP), jnp.float32)],
        ),
        compiler_params=pltpu.CompilerParams(
            dimension_semantics=("parallel",),
        ),
    )(x_tm, w_ih_p, w_hh_p, b_p)
    return out[:B, :H_LSTM]


def stack_encoder_forward(token_ids_seq, table_p, w_ih_p, w_hh_p, b_p):
    """Single-stack forward() equivalent: (T,) token ids -> (1, H)."""
    return encode_stacks(token_ids_seq[None], table_p, w_ih_p, w_hh_p, b_p)


def reference_lstm_batch(x, w_ih, w_hh, b):
    """Pure-JAX f32 reference (lax.scan), unpadded: x (B, T, D) -> (B, H)."""
    H = w_hh.shape[0]
    B = x.shape[0]

    def step(carry, x_t):
        h, c = carry
        gates = x_t @ w_ih + h @ w_hh + b
        i = jax.nn.sigmoid(gates[:, 0 * H:1 * H])
        f = jax.nn.sigmoid(gates[:, 1 * H:2 * H])
        g = jnp.tanh(gates[:, 2 * H:3 * H])
        o = jax.nn.sigmoid(gates[:, 3 * H:4 * H])
        c = f * c + i * g
        h = o * jnp.tanh(c)
        return (h, c), None

    (h, _), _ = lax.scan(
        step, (jnp.zeros((B, H)), jnp.zeros((B, H))), jnp.swapaxes(x, 0, 1))
    return h


if __name__ == "__main__":
    VOCAB = 64   # synthetic "coder" vocabulary size
    SEQ = 8      # tokens per stack
    B = 16       # stacks encoded in one batched call (predict()-style usage)

    key = jax.random.PRNGKey(0)
    k_emb, k_ih, k_hh, k_b, k_tok = jax.random.split(key, 5)

    embedding_table = jax.random.normal(k_emb, (VOCAB, D_EMB), jnp.float32) * 0.1
    w_ih = jax.random.normal(k_ih, (D_EMB, 4 * H_LSTM), jnp.float32) * 0.1
    w_hh = jax.random.normal(k_hh, (H_LSTM, 4 * H_LSTM), jnp.float32) * 0.1
    b = jax.random.normal(k_b, (1, 4 * H_LSTM), jnp.float32) * 0.1  # b_ih + b_hh

    token_ids = jax.random.randint(k_tok, (B, SEQ), 0, VOCAB)

    # One-time parameter padding (the "coder" table to (VOCAB, 128) bf16).
    table_p = pad_embedding_table(embedding_table)
    w_ih_p, w_hh_p, b_p = pad_lstm_params(w_ih, w_hh, b)

    # Batched encode (what predict() needs: anchor + candidate stacks).
    emb = jax.block_until_ready(
        encode_stacks(token_ids, table_p, w_ih_p, w_hh_p, b_p))
    assert emb.shape == (B, H_LSTM)

    # f32 reference (unpadded, f32 embeddings/weights); bf16 kernel needs a
    # relaxed tolerance.
    x_embedded = embedding_table[token_ids]                 # (B, SEQ, D_EMB) f32
    ref = reference_lstm_batch(x_embedded, w_ih, w_hh, b)
    max_err = float(jnp.max(jnp.abs(emb - ref)))
    assert max_err < 3e-2, f"batched mismatch vs reference (max abs err {max_err})"

    # Single-stack forward() path (the module's forward(stack_id) semantics).
    one = jax.block_until_ready(
        stack_encoder_forward(token_ids[0], table_p, w_ih_p, w_hh_p, b_p))
    assert one.shape == (1, H_LSTM)
    assert float(jnp.max(jnp.abs(one - ref[0:1]))) < 3e-2, "single mismatch vs reference"

    # TODO(synk): predict()'s cosine similarity over embeddings is a trivial
    # post-hoc reduction, kept in plain JAX (out of kernel scope), as is the
    # stack_id -> token-sequence lookup of the "coder".
    anchor, cands = emb[0:1], emb[1:]
    _scores = jnp.sum(anchor * cands, axis=1) / (
        jnp.linalg.norm(anchor, axis=1) * jnp.linalg.norm(cands, axis=1) + 1e-8)

    print("KERNEL_OK")
</pallas_src>

<mosaic_0001>
module attributes {stable_mosaic.version = 11 : i64} {
  func.func @lstm_batch_kernel(%arg0: i32, %arg1: memref<8x16x128xbf16, #tpu.memory_space<vmem>>, %arg2: memref<128x512xbf16, #tpu.memory_space<vmem>>, %arg3: memref<128x512xbf16, #tpu.memory_space<vmem>>, %arg4: memref<1x512xf32, #tpu.memory_space<vmem>>, %arg5: memref<16x128xf32, #tpu.memory_space<vmem>>, %arg6: memref<8x16x512xf32, #tpu.memory_space<vmem>>) attributes {dimension_semantics = [#tpu.dimension_semantics<parallel>], iteration_bounds = array<i64: 1>, scalar_prefetch = 0 : i64, scratch_operands = 1 : i64, tpu.core_type = #tpu.core_type<tc>, window_params = [{transform_indices = @transform_0, window_bounds = array<i64: 8, 16, 128>}, {pipeline_mode = #tpu.pipeline_mode<synchronous>, transform_indices = @transform_1, window_bounds = array<i64: 128, 512>}, {pipeline_mode = #tpu.pipeline_mode<synchronous>, transform_indices = @transform_2, window_bounds = array<i64: 128, 512>}, {pipeline_mode = #tpu.pipeline_mode<synchronous>, transform_indices = @transform_3, window_bounds = array<i64: 1, 512>}, {transform_indices = @transform_4, window_bounds = array<i64: 16, 128>}]} {
    %c0 = arith.constant 0 : index
    %c0_0 = arith.constant 0 : index
    %c0_1 = arith.constant 0 : index
    %0 = vector.load %arg1[%c0, %c0_0, %c0_1] : memref<8x16x128xbf16, #tpu.memory_space<vmem>>, vector<8x16x128xbf16>
    %1 = vector.shape_cast %0 : vector<8x16x128xbf16> to vector<128x128xbf16>
    %c0_2 = arith.constant 0 : index
    %c0_3 = arith.constant 0 : index
    %2 = vector.load %arg2[%c0_2, %c0_3] : memref<128x512xbf16, #tpu.memory_space<vmem>>, vector<128x512xbf16>
    %cst = arith.constant dense<0.000000e+00> : vector<128x512xf32>
    %3 = tpu.matmul %1, %2, %cst {dimension_numbers = #tpu.dot_dimension_numbers<[1], [0], [0], [1], [0, 0, 1, 1], [], []>} : vector<128x128xbf16>, vector<128x512xbf16>, vector<128x512xf32> -> vector<128x512xf32>
    %c0_4 = arith.constant 0 : index
    %c0_5 = arith.constant 0 : index
    %4 = vector.load %arg4[%c0_4, %c0_5] : memref<1x512xf32, #tpu.memory_space<vmem>>, vector<1x512xf32>
    %5 = vector.broadcast %4 : vector<1x512xf32> to vector<128x512xf32>
    %6 = arith.addf %3, %5 : vector<128x512xf32>
    %7 = vector.shape_cast %6 : vector<128x512xf32> to vector<8x16x512xf32>
    %c0_6 = arith.constant 0 : index
    %c0_7 = arith.constant 0 : index
    %c0_8 = arith.constant 0 : index
    %8 = vector.load %arg6[%c0_6, %c0_7, %c0_8] : memref<8x16x512xf32, #tpu.memory_space<vmem>>, vector<8x16x512xf32>
    tpu.vector_store %arg6[%c0_6, %c0_7, %c0_8], %7 {strides = array<i32>} : memref<8x16x512xf32, #tpu.memory_space<vmem>>, vector<8x16x512xf32>,
    %c0_9 = arith.constant 0 : index
    %c0_10 = arith.constant 0 : index
    %9 = vector.load %arg3[%c0_9, %c0_10] : memref<128x512xbf16, #tpu.memory_space<vmem>>, vector<128x512xbf16>
    %cst_11 = arith.constant 0.000000e+00 : f32
    %10 = vector.broadcast %cst_11 : f32 to vector<16x128xf32>
    %cst_12 = arith.constant 0.000000e+00 : f32
    %11 = vector.broadcast %cst_12 : f32 to vector<16x128xf32>
    %c0_i32 = arith.constant 0 : i32
    %12 = arith.index_cast %c0_i32 : i32 to index
    %c0_13 = arith.constant 0 : index
    %c0_14 = arith.constant 0 : index
    %13 = vector.load %arg6[%12, %c0_13, %c0_14] : memref<8x16x512xf32, #tpu.memory_space<vmem>>, vector<1x16x512xf32>
    %14 = vector.shape_cast %13 : vector<1x16x512xf32> to vector<16x512xf32>
    %15 = arith.truncf %10 : vector<16x128xf32> to vector<16x128xbf16>
    %cst_15 = arith.constant dense<0.000000e+00> : vector<16x512xf32>
    %16 = tpu.matmul %15, %9, %cst_15 {dimension_numbers = #tpu.dot_dimension_numbers<[1], [0], [0], [1], [0, 0, 1, 1], [], []>} : vector<16x128xbf16>, vector<128x512xbf16>, vector<16x512xf32> -> vector<16x512xf32>
    %17 = arith.addf %14, %16 : vector<16x512xf32>
    %18 = vector.extract_strided_slice %17 {offsets = [0, 0], sizes = [16, 128], strides = [1, 1]} : vector<16x512xf32> to vector<16x128xf32>
    %19 = arith.negf %18 : vector<16x128xf32>
    %20 = math.exp %19 : vector<16x128xf32>
    %cst_16 = arith.constant 1.000000e+00 : f32
    %21 = vector.broadcast %cst_16 : f32 to vector<16x128xf32>
    %22 = arith.addf %21, %20 : vector<16x128xf32>
    %23 = arith.divf %21, %22 : vector<16x128xf32>
    %24 = vector.extract_strided_slice %17 {offsets = [0, 128], sizes = [16, 128], strides = [1, 1]} : vector<16x512xf32> to vector<16x128xf32>
    %25 = arith.negf %24 : vector<16x128xf32>
    %26 = math.exp %25 : vector<16x128xf32>
    %cst_17 = arith.constant 1.000000e+00 : f32
    %27 = vector.broadcast %cst_17 : f32 to vector<16x128xf32>
    %28 = arith.addf %27, %26 : vector<16x128xf32>
    %29 = arith.divf %27, %28 : vector<16x128xf32>
    %30 = vector.extract_strided_slice %17 {offsets = [0, 256], sizes = [16, 128], strides = [1, 1]} : vector<16x512xf32> to vector<16x128xf32>
    %31 = math.tanh %30 : vector<16x128xf32>
    %32 = vector.extract_strided_slice %17 {offsets = [0, 384], sizes = [16, 128], strides = [1, 1]} : vector<16x512xf32> to vector<16x128xf32>
    %33 = arith.negf %32 : vector<16x128xf32>
    %34 = math.exp %33 : vector<16x128xf32>
    %cst_18 = arith.constant 1.000000e+00 : f32
    %35 = vector.broadcast %cst_18 : f32 to vector<16x128xf32>
    %36 = arith.addf %35, %34 : vector<16x128xf32>
    %37 = arith.divf %35, %36 : vector<16x128xf32>
    %38 = arith.mulf %29, %11 : vector<16x128xf32>
    %39 = arith.mulf %23, %31 : vector<16x128xf32>
    %40 = arith.addf %38, %39 : vector<16x128xf32>
    %41 = math.tanh %40 : vector<16x128xf32>
    %42 = arith.mulf %37, %41 : vector<16x128xf32>
    %c1_i32 = arith.constant 1 : i32
    %43 = arith.index_cast %c1_i32 : i32 to index
    %c0_19 = arith.constant 0 : index
    %c0_20 = arith.constant 0 : index
    %44 = vector.load %arg6[%43, %c0_19, %c0_20] : memref<8x16x512xf32, #tpu.memory_space<vmem>>, vector<1x16x512xf32>
    %45 = vector.shape_cast %44 : vector<1x16x512xf32> to vector<16x512xf32>
    %46 = arith.truncf %42 : vector<16x128xf32> to vector<16x128xbf16>
    %cst_21 = arith.constant dense<0.000000e+00> : vector<16x512xf32>
    %47 = tpu.matmul %46, %9, %cst_21 {dimension_numbers = #tpu.dot_dimension_numbers<[1], [0], [0], [1], [0, 0, 1, 1], [], []>} : vector<16x128xbf16>, vector<128x512xbf16>, vector<16x512xf32> -> vector<16x512xf32>
    %48 = arith.addf %45, %47 : vector<16x512xf32>
    %49 = vector.extract_strided_slice %48 {offsets = [0, 0], sizes = [16, 128], strides = [1, 1]} : vector<16x512xf32> to vector<16x128xf32>
    %50 = arith.negf %49 : vector<16x128xf32>
    %51 = math.exp %50 : vector<16x128xf32>
    %cst_22 = arith.constant 1.000000e+00 : f32
    %52 = vector.broadcast %cst_22 : f32 to vector<16x128xf32>
    %53 = arith.addf %52, %51 : vector<16x128xf32>
    %54 = arith.divf %52, %53 : vector<16x128xf32>
    %55 = vector.extract_strided_slice %48 {offsets = [0, 128], sizes = [16, 128], strides = [1, 1]} : vector<16x512xf32> to vector<16x128xf32>
    %56 = arith.negf %55 : vector<16x128xf32>
    %57 = math.exp %56 : vector<16x128xf32>
    %cst_23 = arith.constant 1.000000e+00 : f32
    %58 = vector.broadcast %cst_23 : f32 to vector<16x128xf32>
    %59 = arith.addf %58, %57 : vector<16x128xf32>
    %60 = arith.divf %58, %59 : vector<16x128xf32>
    %61 = vector.extract_strided_slice %48 {offsets = [0, 256], sizes = [16, 128], strides = [1, 1]} : vector<16x512xf32> to vector<16x128xf32>
    %62 = math.tanh %61 : vector<16x128xf32>
    %63 = vector.extract_strided_slice %48 {offsets = [0, 384], sizes = [16, 128], strides = [1, 1]} : vector<16x512xf32> to vector<16x128xf32>
    %64 = arith.negf %63 : vector<16x128xf32>
    %65 = math.exp %64 : vector<16x128xf32>
    %cst_24 = arith.constant 1.000000e+00 : f32
    %66 = vector.broadcast %cst_24 : f32 to vector<16x128xf32>
    %67 = arith.addf %66, %65 : vector<16x128xf32>
    %68 = arith.divf %66, %67 : vector<16x128xf32>
    %69 = arith.mulf %60, %40 : vector<16x128xf32>
    %70 = arith.mulf %54, %62 : vector<16x128xf32>
    %71 = arith.addf %69, %70 : vector<16x128xf32>
    %72 = math.tanh %71 : vector<16x128xf32>
    %73 = arith.mulf %68, %72 : vector<16x128xf32>
    %c2_i32 = arith.constant 2 : i32
    %74 = arith.index_cast %c2_i32 : i32 to index
    %c0_25 = arith.constant 0 : index
    %c0_26 = arith.constant 0 : index
    %75 = vector.load %arg6[%74, %c0_25, %c0_26] : memref<8x16x512xf32, #tpu.memory_space<vmem>>, vector<1x16x512xf32>
    %76 = vector.shape_cast %75 : vector<1x16x512xf32> to vector<16x512xf32>
    %77 = arith.truncf %73 : vector<16x128xf32> to vector<16x128xbf16>
    %cst_27 = arith.constant dense<0.000000e+00> : vector<16x512xf32>
    %78 = tpu.matmul %77, %9, %cst_27 {dimension_numbers = #tpu.dot_dimension_numbers<[1], [0], [0], [1], [0, 0, 1, 1], [], []>} : vector<16x128xbf16>, vector<128x512xbf16>, vector<16x512xf32> -> vector<16x512xf32>
    %79 = arith.addf %76, %78 : vector<16x512xf32>
    %80 = vector.extract_strided_slice %79 {offsets = [0, 0], sizes = [16, 128], strides = [1, 1]} : vector<16x512xf32> to vector<16x128xf32>
    %81 = arith.negf %80 : vector<16x128xf32>
    %82 = math.exp %81 : vector<16x128xf32>
    %cst_28 = arith.constant 1.000000e+00 : f32
    %83 = vector.broadcast %cst_28 : f32 to vector<16x128xf32>
    %84 = arith.addf %83, %82 : vector<16x128xf32>
    %85 = arith.divf %83, %84 : vector<16x128xf32>
    %86 = vector.extract_strided_slice %79 {offsets = [0, 128], sizes = [16, 128], strides = [1, 1]} : vector<16x512xf32> to vector<16x128xf32>
    %87 = arith.negf %86 : vector<16x128xf32>
    %88 = math.exp %87 : vector<16x128xf32>
    %cst_29 = arith.constant 1.000000e+00 : f32
    %89 = vector.broadcast %cst_29 : f32 to vector<16x128xf32>
    %90 = arith.addf %89, %88 : vector<16x128xf32>
    %91 = arith.divf %89, %90 : vector<16x128xf32>
    %92 = vector.extract_strided_slice %79 {offsets = [0, 256], sizes = [16, 128], strides = [1, 1]} : vector<16x512xf32> to vector<16x128xf32>
    %93 = math.tanh %92 : vector<16x128xf32>
    %94 = vector.extract_strided_slice %79 {offsets = [0, 384], sizes = [16, 128], strides = [1, 1]} : vector<16x512xf32> to vector<16x128xf32>
    %95 = arith.negf %94 : vector<16x128xf32>
    %96 = math.exp %95 : vector<16x128xf32>
    %cst_30 = arith.constant 1.000000e+00 : f32
    %97 = vector.broadcast %cst_30 : f32 to vector<16x128xf32>
    %98 = arith.addf %97, %96 : vector<16x128xf32>
    %99 = arith.divf %97, %98 : vector<16x128xf32>
    %100 = arith.mulf %91, %71 : vector<16x128xf32>
    %101 = arith.mulf %85, %93 : vector<16x128xf32>
    %102 = arith.addf %100, %101 : vector<16x128xf32>
    %103 = math.tanh %102 : vector<16x128xf32>
    %104 = arith.mulf %99, %103 : vector<16x128xf32>
    %c3_i32 = arith.constant 3 : i32
    %105 = arith.index_cast %c3_i32 : i32 to index
    %c0_31 = arith.constant 0 : index
    %c0_32 = arith.constant 0 : index
    %106 = vector.load %arg6[%105, %c0_31, %c0_32] : memref<8x16x512xf32, #tpu.memory_space<vmem>>, vector<1x16x512xf32>
    %107 = vector.shape_cast %106 : vector<1x16x512xf32> to vector<16x512xf32>
    %108 = arith.truncf %104 : vector<16x128xf32> to vector<16x128xbf16>
    %cst_33 = arith.constant dense<0.000000e+00> : vector<16x512xf32>
    %109 = tpu.matmul %108, %9, %cst_33 {dimension_numbers = #tpu.dot_dimension_numbers<[1], [0], [0], [1], [0, 0, 1, 1], [], []>} : vector<16x128xbf16>, vector<128x512xbf16>, vector<16x512xf32> -> vector<16x512xf32>
    %110 = arith.addf %107, %109 : vector<16x512xf32>
    %111 = vector.extract_strided_slice %110 {offsets = [0, 0], sizes = [16, 128], strides = [1, 1]} : vector<16x512xf32> to vector<16x128xf32>
    %112 = arith.negf %111 : vector<16x128xf32>
    %113 = math.exp %112 : vector<16x128xf32>
    %cst_34 = arith.constant 1.000000e+00 : f32
    %114 = vector.broadcast %cst_34 : f32 to vector<16x128xf32>
    %115 = arith.addf %114, %113 : vector<16x128xf32>
    %116 = arith.divf %114, %115 : vector<16x128xf32>
    %117 = vector.extract_strided_slice %110 {offsets = [0, 128], sizes = [16, 128], strides = [1, 1]} : vector<16x512xf32> to vector<16x128xf32>
    %118 = arith.negf %117 : vector<16x128xf32>
    %119 = math.exp %118 : vector<16x128xf32>
    %cst_35 = arith.constant 1.000000e+00 : f32
    %120 = vector.broadcast %cst_35 : f32 to vector<16x128xf32>
    %121 = arith.addf %120, %119 : vector<16x128xf32>
    %122 = arith.divf %120, %121 : vector<16x128xf32>
    %123 = vector.extract_strided_slice %110 {offsets = [0, 256], sizes = [16, 128], strides = [1, 1]} : vector<16x512xf32> to vector<16x128xf32>
    %124 = math.tanh %123 : vector<16x128xf32>
    %125 = vector.extract_strided_slice %110 {offsets = [0, 384], sizes = [16, 128], strides = [1, 1]} : vector<16x512xf32> to vector<16x128xf32>
    %126 = arith.negf %125 : vector<16x128xf32>
    %127 = math.exp %126 : vector<16x128xf32>
    %cst_36 = arith.constant 1.000000e+00 : f32
    %128 = vector.broadcast %cst_36 : f32 to vector<16x128xf32>
    %129 = arith.addf %128, %127 : vector<16x128xf32>
    %130 = arith.divf %128, %129 : vector<16x128xf32>
    %131 = arith.mulf %122, %102 : vector<16x128xf32>
    %132 = arith.mulf %116, %124 : vector<16x128xf32>
    %133 = arith.addf %131, %132 : vector<16x128xf32>
    %134 = math.tanh %133 : vector<16x128xf32>
    %135 = arith.mulf %130, %134 : vector<16x128xf32>
    %c4_i32 = arith.constant 4 : i32
    %136 = arith.index_cast %c4_i32 : i32 to index
    %c0_37 = arith.constant 0 : index
    %c0_38 = arith.constant 0 : index
    %137 = vector.load %arg6[%136, %c0_37, %c0_38] : memref<8x16x512xf32, #tpu.memory_space<vmem>>, vector<1x16x512xf32>
    %138 = vector.shape_cast %137 : vector<1x16x512xf32> to vector<16x512xf32>
    %139 = arith.truncf %135 : vector<16x128xf32> to vector<16x128xbf16>
    %cst_39 = arith.constant dense<0.000000e+00> : vector<16x512xf32>
    %140 = tpu.matmul %139, %9, %cst_39 {dimension_numbers = #tpu.dot_dimension_numbers<[1], [0], [0], [1], [0, 0, 1, 1], [], []>} : vector<16x128xbf16>, vector<128x512xbf16>, vector<16x512xf32> -> vector<16x512xf32>
    %141 = arith.addf %138, %140 : vector<16x512xf32>
    %142 = vector.extract_strided_slice %141 {offsets = [0, 0], sizes = [16, 128], strides = [1, 1]} : vector<16x512xf32> to vector<16x128xf32>
    %143 = arith.negf %142 : vector<16x128xf32>
    %144 = math.exp %143 : vector<16x128xf32>
    %cst_40 = arith.constant 1.000000e+00 : f32
    %145 = vector.broadcast %cst_40 : f32 to vector<16x128xf32>
    %146 = arith.addf %145, %144 : vector<16x128xf32>
    %147 = arith.divf %145, %146 : vector<16x128xf32>
    %148 = vector.extract_strided_slice %141 {offsets = [0, 128], sizes = [16, 128], strides = [1, 1]} : vector<16x512xf32> to vector<16x128xf32>
    %149 = arith.negf %148 : vector<16x128xf32>
    %150 = math.exp %149 : vector<16x128xf32>
    %cst_41 = arith.constant 1.000000e+00 : f32
    %151 = vector.broadcast %cst_41 : f32 to vector<16x128xf32>
    %152 = arith.addf %151, %150 : vector<16x128xf32>
    %153 = arith.divf %151, %152 : vector<16x128xf32>
    %154 = vector.extract_strided_slice %141 {offsets = [0, 256], sizes = [16, 128], strides = [1, 1]} : vector<16x512xf32> to vector<16x128xf32>
    %155 = math.tanh %154 : vector<16x128xf32>
    %156 = vector.extract_strided_slice %141 {offsets = [0, 384], sizes = [16, 128], strides = [1, 1]} : vector<16x512xf32> to vector<16x128xf32>
    %157 = arith.negf %156 : vector<16x128xf32>
    %158 = math.exp %157 : vector<16x128xf32>
    %cst_42 = arith.constant 1.000000e+00 : f32
    %159 = vector.broadcast %cst_42 : f32 to vector<16x128xf32>
    %160 = arith.addf %159, %158 : vector<16x128xf32>
    %161 = arith.divf %159, %160 : vector<16x128xf32>
    %162 = arith.mulf %153, %133 : vector<16x128xf32>
    %163 = arith.mulf %147, %155 : vector<16x128xf32>
    %164 = arith.addf %162, %163 : vector<16x128xf32>
    %165 = math.tanh %164 : vector<16x128xf32>
    %166 = arith.mulf %161, %165 : vector<16x128xf32>
    %c5_i32 = arith.constant 5 : i32
    %167 = arith.index_cast %c5_i32 : i32 to index
    %c0_43 = arith.constant 0 : index
    %c0_44 = arith.constant 0 : index
    %168 = vector.load %arg6[%167, %c0_43, %c0_44] : memref<8x16x512xf32, #tpu.memory_space<vmem>>, vector<1x16x512xf32>
    %169 = vector.shape_cast %168 : vector<1x16x512xf32> to vector<16x512xf32>
    %170 = arith.truncf %166 : vector<16x128xf32> to vector<16x128xbf16>
    %cst_45 = arith.constant dense<0.000000e+00> : vector<16x512xf32>
    %171 = tpu.matmul %170, %9, %cst_45 {dimension_numbers = #tpu.dot_dimension_numbers<[1], [0], [0], [1], [0, 0, 1, 1], [], []>} : vector<16x128xbf16>, vector<128x512xbf16>, vector<16x512xf32> -> vector<16x512xf32>
    %172 = arith.addf %169, %171 : vector<16x512xf32>
    %173 = vector.extract_strided_slice %172 {offsets = [0, 0], sizes = [16, 128], strides = [1, 1]} : vector<16x512xf32> to vector<16x128xf32>
    %174 = arith.negf %173 : vector<16x128xf32>
    %175 = math.exp %174 : vector<16x128xf32>
    %cst_46 = arith.constant 1.000000e+00 : f32
    %176 = vector.broadcast %cst_46 : f32 to vector<16x128xf32>
    %177 = arith.addf %176, %175 : vector<16x128xf32>
    %178 = arith.divf %176, %177 : vector<16x128xf32>
    %179 = vector.extract_strided_slice %172 {offsets = [0, 128], sizes = [16, 128], strides = [1, 1]} : vector<16x512xf32> to vector<16x128xf32>
    %180 = arith.negf %179 : vector<16x128xf32>
    %181 = math.exp %180 : vector<16x128xf32>
    %cst_47 = arith.constant 1.000000e+00 : f32
    %182 = vector.broadcast %cst_47 : f32 to vector<16x128xf32>
    %183 = arith.addf %182, %181 : vector<16x128xf32>
    %184 = arith.divf %182, %183 : vector<16x128xf32>
    %185 = vector.extract_strided_slice %172 {offsets = [0, 256], sizes = [16, 128], strides = [1, 1]} : vector<16x512xf32> to vector<16x128xf32>
    %186 = math.tanh %185 : vector<16x128xf32>
    %187 = vector.extract_strided_slice %172 {offsets = [0, 384], sizes = [16, 128], strides = [1, 1]} : vector<16x512xf32> to vector<16x128xf32>
    %188 = arith.negf %187 : vector<16x128xf32>
    %189 = math.exp %188 : vector<16x128xf32>
    %cst_48 = arith.constant 1.000000e+00 : f32
    %190 = vector.broadcast %cst_48 : f32 to vector<16x128xf32>
    %191 = arith.addf %190, %189 : vector<16x128xf32>
    %192 = arith.divf %190, %191 : vector<16x128xf32>
    %193 = arith.mulf %184, %164 : vector<16x128xf32>
    %194 = arith.mulf %178, %186 : vector<16x128xf32>
    %195 = arith.addf %193, %194 : vector<16x128xf32>
    %196 = math.tanh %195 : vector<16x128xf32>
    %197 = arith.mulf %192, %196 : vector<16x128xf32>
    %c6_i32 = arith.constant 6 : i32
    %198 = arith.index_cast %c6_i32 : i32 to index
    %c0_49 = arith.constant 0 : index
    %c0_50 = arith.constant 0 : index
    %199 = vector.load %arg6[%198, %c0_49, %c0_50] : memref<8x16x512xf32, #tpu.memory_space<vmem>>, vector<1x16x512xf32>
    %200 = vector.shape_cast %199 : vector<1x16x512xf32> to vector<16x512xf32>
    %201 = arith.truncf %197 : vector<16x128xf32> to vector<16x128xbf16>
    %cst_51 = arith.constant dense<0.000000e+00> : vector<16x512xf32>
    %202 = tpu.matmul %201, %9, %cst_51 {dimension_numbers = #tpu.dot_dimension_numbers<[1], [0], [0], [1], [0, 0, 1, 1], [], []>} : vector<16x128xbf16>, vector<128x512xbf16>, vector<16x512xf32> -> vector<16x512xf32>
    %203 = arith.addf %200, %202 : vector<16x512xf32>
    %204 = vector.extract_strided_slice %203 {offsets = [0, 0], sizes = [16, 128], strides = [1, 1]} : vector<16x512xf32> to vector<16x128xf32>
    %205 = arith.negf %204 : vector<16x128xf32>
    %206 = math.exp %205 : vector<16x128xf32>
    %cst_52 = arith.constant 1.000000e+00 : f32
    %207 = vector.broadcast %cst_52 : f32 to vector<16x128xf32>
    %208 = arith.addf %207, %206 : vector<16x128xf32>
    %209 = arith.divf %207, %208 : vector<16x128xf32>
    %210 = vector.extract_strided_slice %203 {offsets = [0, 128], sizes = [16, 128], strides = [1, 1]} : vector<16x512xf32> to vector<16x128xf32>
    %211 = arith.negf %210 : vector<16x128xf32>
    %212 = math.exp %211 : vector<16x128xf32>
    %cst_53 = arith.constant 1.000000e+00 : f32
    %213 = vector.broadcast %cst_53 : f32 to vector<16x128xf32>
    %214 = arith.addf %213, %212 : vector<16x128xf32>
    %215 = arith.divf %213, %214 : vector<16x128xf32>
    %216 = vector.extract_strided_slice %203 {offsets = [0, 256], sizes = [16, 128], strides = [1, 1]} : vector<16x512xf32> to vector<16x128xf32>
    %217 = math.tanh %216 : vector<16x128xf32>
    %218 = vector.extract_strided_slice %203 {offsets = [0, 384], sizes = [16, 128], strides = [1, 1]} : vector<16x512xf32> to vector<16x128xf32>
    %219 = arith.negf %218 : vector<16x128xf32>
    %220 = math.exp %219 : vector<16x128xf32>
    %cst_54 = arith.constant 1.000000e+00 : f32
    %221 = vector.broadcast %cst_54 : f32 to vector<16x128xf32>
    %222 = arith.addf %221, %220 : vector<16x128xf32>
    %223 = arith.divf %221, %222 : vector<16x128xf32>
    %224 = arith.mulf %215, %195 : vector<16x128xf32>
    %225 = arith.mulf %209, %217 : vector<16x128xf32>
    %226 = arith.addf %224, %225 : vector<16x128xf32>
    %227 = math.tanh %226 : vector<16x128xf32>
    %228 = arith.mulf %223, %227 : vector<16x128xf32>
    %c7_i32 = arith.constant 7 : i32
    %229 = arith.index_cast %c7_i32 : i32 to index
    %c0_55 = arith.constant 0 : index
    %c0_56 = arith.constant 0 : index
    %230 = vector.load %arg6[%229, %c0_55, %c0_56] : memref<8x16x512xf32, #tpu.memory_space<vmem>>, vector<1x16x512xf32>
    %231 = vector.shape_cast %230 : vector<1x16x512xf32> to vector<16x512xf32>
    %232 = arith.truncf %228 : vector<16x128xf32> to vector<16x128xbf16>
    %cst_57 = arith.constant dense<0.000000e+00> : vector<16x512xf32>
    %233 = tpu.matmul %232, %9, %cst_57 {dimension_numbers = #tpu.dot_dimension_numbers<[1], [0], [0], [1], [0, 0, 1, 1], [], []>} : vector<16x128xbf16>, vector<128x512xbf16>, vector<16x512xf32> -> vector<16x512xf32>
    %234 = arith.addf %231, %233 : vector<16x512xf32>
    %235 = vector.extract_strided_slice %234 {offsets = [0, 0], sizes = [16, 128], strides = [1, 1]} : vector<16x512xf32> to vector<16x128xf32>
    %236 = arith.negf %235 : vector<16x128xf32>
    %237 = math.exp %236 : vector<16x128xf32>
    %cst_58 = arith.constant 1.000000e+00 : f32
    %238 = vector.broadcast %cst_58 : f32 to vector<16x128xf32>
    %239 = arith.addf %238, %237 : vector<16x128xf32>
    %240 = arith.divf %238, %239 : vector<16x128xf32>
    %241 = vector.extract_strided_slice %234 {offsets = [0, 128], sizes = [16, 128], strides = [1, 1]} : vector<16x512xf32> to vector<16x128xf32>
    %242 = arith.negf %241 : vector<16x128xf32>
    %243 = math.exp %242 : vector<16x128xf32>
    %cst_59 = arith.constant 1.000000e+00 : f32
    %244 = vector.broadcast %cst_59 : f32 to vector<16x128xf32>
    %245 = arith.addf %244, %243 : vector<16x128xf32>
    %246 = arith.divf %244, %245 : vector<16x128xf32>
    %247 = vector.extract_strided_slice %234 {offsets = [0, 256], sizes = [16, 128], strides = [1, 1]} : vector<16x512xf32> to vector<16x128xf32>
    %248 = math.tanh %247 : vector<16x128xf32>
    %249 = vector.extract_strided_slice %234 {offsets = [0, 384], sizes = [16, 128], strides = [1, 1]} : vector<16x512xf32> to vector<16x128xf32>
    %250 = arith.negf %249 : vector<16x128xf32>
    %251 = math.exp %250 : vector<16x128xf32>
    %cst_60 = arith.constant 1.000000e+00 : f32
    %252 = vector.broadcast %cst_60 : f32 to vector<16x128xf32>
    %253 = arith.addf %252, %251 : vector<16x128xf32>
    %254 = arith.divf %252, %253 : vector<16x128xf32>
    %255 = arith.mulf %246, %226 : vector<16x128xf32>
    %256 = arith.mulf %240, %248 : vector<16x128xf32>
    %257 = arith.addf %255, %256 : vector<16x128xf32>
    %258 = math.tanh %257 : vector<16x128xf32>
    %259 = arith.mulf %254, %258 : vector<16x128xf32>
    %c8_i32 = arith.constant 8 : i32
    %c0_61 = arith.constant 0 : index
    %c0_62 = arith.constant 0 : index
    %260 = vector.load %arg5[%c0_61, %c0_62] : memref<16x128xf32, #tpu.memory_space<vmem>>, vector<16x128xf32>
    tpu.vector_store %arg5[%c0_61, %c0_62], %259 {strides = array<i32>} : memref<16x128xf32, #tpu.memory_space<vmem>>, vector<16x128xf32>,
    return
  }
  func.func @transform_0(%arg0: i32) -> (i32, i32, i32) {
    %c0_i32 = arith.constant 0 : i32
    %c0_i32_0 = arith.constant 0 : i32
    %c0_i32_1 = arith.constant 0 : i32
    return %c0_i32, %arg0, %c0_i32_0 : i32, i32, i32
  }
  func.func @transform_1(%arg0: i32) -> (i32, i32) {
    %c0_i32 = arith.constant 0 : i32
    %c0_i32_0 = arith.constant 0 : i32
    %c0_i32_1 = arith.constant 0 : i32
    return %c0_i32, %c0_i32_0 : i32, i32
  }
  func.func @transform_2(%arg0: i32) -> (i32, i32) {
    %c0_i32 = arith.constant 0 : i32
    %c0_i32_0 = arith.constant 0 : i32
    %c0_i32_1 = arith.constant 0 : i32
    return %c0_i32, %c0_i32_0 : i32, i32
  }
  func.func @transform_3(%arg0: i32) -> (i32, i32) {
    %c0_i32 = arith.constant 0 : i32
    %c0_i32_0 = arith.constant 0 : i32
    %c0_i32_1 = arith.constant 0 : i32
    return %c0_i32, %c0_i32_0 : i32, i32
  }
  func.func @transform_4(%arg0: i32) -> (i32, i32) {
    %c0_i32 = arith.constant 0 : i32
    %c0_i32_0 = arith.constant 0 : i32
    return %arg0, %c0_i32 : i32, i32
  }
}

</mosaic_0001>

<bundles_post_ra>
// kernel: tpu_custom_call.1
= control target key start
LH: loop header
LB: loop body
LE: loop exit
PB: predicated region body
PF: predicated region fallthrough
CT: control target
= control target key end

     0   :  { %9 = vsyncpa [#allocation4], 0  ;;  %s3438_s0 = inlined_call_operand.hbm [shape: bf16[8,16,128], index: 0, kind: input, shape index: {}]   ;;  %s3439_s1 = inlined_call_operand.hbm [shape: bf16[128,512], index: 1, kind: input, shape index: {}]   ;;  %s3440_s2 = inlined_call_operand.hbm [shape: bf16[128,512], index: 2, kind: input, shape index: {}]   ;;  %s3441_s3 = inlined_call_operand.vmem [shape: f32[1,512], index: 3, kind: input, shape index: {}]   ;;  %s3442_s4 = inlined_call_operand.hbm [shape: f32[16,128], index: 4, kind: output, shape index: {}]  }
   0x1   :  { %10 = vsyncpa [#allocation7], 0 }
   0x2   :  { %11 = vsyncpa [#allocation5], 0  ;;  %s2799_s15 = smov [#allocation6]   ;;  %s2705_s19 = scalar_lea.hbm %s3439_s1, 4096 }
   0x3   :  { %s29_s16 = sshll.u32 %s2799_s15, 4  ;;  %p2706_p0 = scmp.ne.s32.totalorder %s3439_s1, %s2705_s19  ;;  %s30_s16 = int_to_ptr.vmem [resolvable:$true] %s29_s16 }
   0x4   :  { %p2709_p1 = scmp.lt.u32.totalorder %s2705_s19, %s3439_s1 }
   0x6   :  { %p2711_p2 = pnand %p2709_p1, %p2706_p0 }
   0x8   :  { %2714 = shalt.err (!%p2711_p2)
}
   0x9   :  { %s2715_s24 = scalar_lea.vmem %s30_s16, 4096  ;;  %p2720_p4 = scmp.lt.s32.totalorder %s30_s16, %s30_s16 }
   0xa   :  { %p2716_p3 = scmp.ne.s32.totalorder %s30_s16, %s2715_s24  ;;  %p2721_p5 = scmp.lt.s32.totalorder %s2715_s24, %s2715_s24 }
   0xc   :  { %p2722_p6 = por %p2721_p5, %p2720_p4 }
   0xe   :  { %p2723_p7 = pnand %p2722_p6, %p2716_p3 }
  0x10   :  { %2726 = shalt.err (!%p2723_p7)
}
  0x11   :  { %s2800_s25 = smov 256   ;;  %s2801_s26 = smov 16  }
  0x12   :  { %35 = dma.hbm_to_vmem [thread:$0]  %s3439_s1, 4096, %s30_s16, [#allocation7], %s2800_s25, %s2800_s25, %s2801_s26  }
  0x13   :  { %s2802_s29 = smov [#allocation3]   ;;  %s2727_s7 = scalar_lea.hbm %s3438_s0, 1024 }
  0x14   :  { %s17_s30 = sshll.u32 %s2802_s29, 4  ;;  %p2728_p8 = scmp.ne.s32.totalorder %s3438_s0, %s2727_s7  ;;  %s18_s30 = int_to_ptr.vmem [resolvable:$true] %s17_s30 }
  0x15   :  { %p2731_p9 = scmp.lt.u32.totalorder %s2727_s7, %s3438_s0 }
  0x17   :  { %p2733_p10 = pnand %p2731_p9, %p2728_p8 }
  0x19   :  { %2736 = shalt.err (!%p2733_p10)
}
  0x1a   :  { %s2737_s12 = scalar_lea.vmem %s18_s30, 1024  ;;  %p2742_p12 = scmp.lt.s32.totalorder %s18_s30, %s18_s30 }
  0x1b   :  { %p2738_p11 = scmp.ne.s32.totalorder %s18_s30, %s2737_s12  ;;  %p2743_p13 = scmp.lt.s32.totalorder %s2737_s12, %s2737_s12 }
  0x1d   :  { %p2744_p0 = por %p2743_p13, %p2742_p12 }
  0x1f   :  { %p2745_p1 = pnand %p2744_p0, %p2738_p11 }
  0x21   :  { %2748 = shalt.err (!%p2745_p1)
}
  0x22   :  { %s2803_s1 = smov 64   ;;  %s2804_s13 = smov 4  }
  0x23   :  { %23 = dma.hbm_to_vmem [thread:$0]  %s3438_s0, 1024, %s18_s30, [#allocation4], %s2803_s1, %s2803_s1, %s2804_s13  }
  0x24   :  { %s2805_s16 = smov [#allocation8]   ;;  %s2749_s20 = scalar_lea.hbm %s3440_s2, 4096 }
  0x25   :  { %s41_s17 = sshll.u32 %s2805_s16, 4  ;;  %p2750_p2 = scmp.ne.s32.totalorder %s3440_s2, %s2749_s20  ;;  %s42_s17 = int_to_ptr.vmem [resolvable:$true] %s41_s17 }
  0x26   :  { %p2753_p3 = scmp.lt.u32.totalorder %s2749_s20, %s3440_s2 }
  0x28   :  { %p2755_p4 = pnand %p2753_p3, %p2750_p2 }
  0x2a   :  { %2758 = shalt.err (!%p2755_p4)
}
  0x2b   :  { %s2759_s27 = scalar_lea.vmem %s42_s17, 4096  ;;  %p2764_p6 = scmp.lt.s32.totalorder %s42_s17, %s42_s17 }
  0x2c   :  { %p2760_p5 = scmp.ne.s32.totalorder %s42_s17, %s2759_s27  ;;  %p2765_p7 = scmp.lt.s32.totalorder %s2759_s27, %s2759_s27 }
  0x2e   :  { %p2766_p8 = por %p2765_p7, %p2764_p6 }
  0x30   :  { %p2767_p9 = pnand %p2766_p8, %p2760_p5 }
  0x32   :  { %2770 = shalt.err (!%p2767_p9)
}
  0x33   :  { %47 = dma.hbm_to_vmem [thread:$0]  %s3440_s2, 4096, %s42_s17, [#allocation7], %s2800_s25, %s2800_s25, %s2801_s26  }
  0x34   :  { %2793 = dma.done.wait [#allocation4], 1024  }
  0x35   :  { %2794 = vsyncadd [#allocation4], 4294966272 }
  0x36   :  { %2795 = dma.done.wait [#allocation7], 8192  }
  0x37   :  { %2796 = vsyncadd [#allocation7], 4294959104  ;;  %v2806_v0 = vmov 0   ;;  %v2313_v1 = vld [vmem:[#allocation6 + $0x4] ss:$16 sps:$4 sm:$0xff]   ;;  %v2365_v43 = vld [vmem:[#allocation3 + $0x8] sm:$0xff]  }
  0x38   :  { %370 = vmatprep.mubr.bf16.mxu0 %v2806_v0  ;;  %483 = vmatprep.mubr.bf16.mxu1 %v2806_v0  ;;  %v2315_v2 = vld [vmem:[#allocation6 + $0xc] ss:$16 sps:$4 sm:$0xff]   ;;  %v2317_v3 = vld [vmem:[#allocation6] ss:$16 sps:$4 sm:$0xff]   ;;  %v2318_v4 = vld [vmem:[#allocation6 + $0x8] ss:$16 sps:$4 sm:$0xff]  }
  0x39   :  { %338 = vmatprep.subr.bf16.mxu0 %v2313_v1  ;;  %451 = vmatprep.subr.bf16.mxu1 %v2315_v2  ;;  %v2319_v5 = vld [vmem:[#allocation6 + $0x24] ss:$16 sps:$4 sm:$0xff]   ;;  %v2321_v6 = vld [vmem:[#allocation6 + $0x2c] ss:$16 sps:$4 sm:$0xff]   ;;  %v2323_v7 = vld [vmem:[#allocation6 + $0x20] ss:$16 sps:$4 sm:$0xff]  }
  0x3a   :  { %339 = vmatpush1.bf16.msra.mxu0 %v2317_v3  ;;  %452 = vmatpush1.bf16.msra.mxu1 %v2318_v4  ;;  %v2324_v8 = vld [vmem:[#allocation6 + $0x28] ss:$16 sps:$4 sm:$0xff]   ;;  %v2325_v9 = vld [vmem:[#allocation6 + $0x44] ss:$16 sps:$4 sm:$0xff]   ;;  %v2327_v10 = vld [vmem:[#allocation6 + $0x4c] ss:$16 sps:$4 sm:$0xff]  }
  0x3b   :  { %340 = vmatprep.subr.bf16.mxu0 %v2319_v5  ;;  %453 = vmatprep.subr.bf16.mxu1 %v2321_v6  ;;  %v2329_v11 = vld [vmem:[#allocation6 + $0x40] ss:$16 sps:$4 sm:$0xff]   ;;  %v2330_v12 = vld [vmem:[#allocation6 + $0x48] ss:$16 sps:$4 sm:$0xff]   ;;  %v2331_v13 = vld [vmem:[#allocation6 + $0x64] ss:$16 sps:$4 sm:$0xff]  }
  0x3c   :  { %v2333_v14 = vld [vmem:[#allocation6 + $0x6c] ss:$16 sps:$4 sm:$0xff]   ;;  %v2335_v15 = vld [vmem:[#allocation6 + $0x60] ss:$16 sps:$4 sm:$0xff]   ;;  %v2336_v16 = vld [vmem:[#allocation6 + $0x68] ss:$16 sps:$4 sm:$0xff]  }
  0x3d   :  { %v2337_v17 = vld [vmem:[#allocation6 + $0x84] ss:$16 sps:$4 sm:$0xff]   ;;  %v2339_v18 = vld [vmem:[#allocation6 + $0x8c] ss:$16 sps:$4 sm:$0xff]   ;;  %v2341_v19 = vld [vmem:[#allocation6 + $0x80] ss:$16 sps:$4 sm:$0xff]  }
  0x3e   :  { %341 = vmatpush1.bf16.msra.mxu0 %v2323_v7  ;;  %454 = vmatpush1.bf16.msra.mxu1 %v2324_v8  ;;  %v2342_v20 = vld [vmem:[#allocation6 + $0x88] ss:$16 sps:$4 sm:$0xff]   ;;  %v2343_v21 = vld [vmem:[#allocation6 + $0xa4] ss:$16 sps:$4 sm:$0xff]   ;;  %v2345_v22 = vld [vmem:[#allocation6 + $0xac] ss:$16 sps:$4 sm:$0xff]  }
  0x3f   :  { %342 = vmatprep.subr.bf16.mxu0 %v2325_v9  ;;  %455 = vmatprep.subr.bf16.mxu1 %v2327_v10  ;;  %v2347_v23 = vld [vmem:[#allocation6 + $0xa0] ss:$16 sps:$4 sm:$0xff]   ;;  %v2348_v24 = vld [vmem:[#allocation6 + $0xa8] ss:$16 sps:$4 sm:$0xff]   ;;  %v2349_v25 = vld [vmem:[#allocation6 + $0xc4] ss:$16 sps:$4 sm:$0xff]   ;;  %v110_v10 = vlaneseq }
  0x40   :  { %v2351_v26 = vld [vmem:[#allocation6 + $0xcc] ss:$16 sps:$4 sm:$0xff]   ;;  %v2353_v27 = vld [vmem:[#allocation6 + $0xc0] ss:$16 sps:$4 sm:$0xff]   ;;  %v2354_v28 = vld [vmem:[#allocation6 + $0xc8] ss:$16 sps:$4 sm:$0xff]  }
  0x41   :  { %v2355_v29 = vld [vmem:[#allocation6 + $0xe4] ss:$16 sps:$4 sm:$0xff]   ;;  %v2357_v30 = vld [vmem:[#allocation6 + $0xec] ss:$16 sps:$4 sm:$0xff]   ;;  %v2359_v31 = vld [vmem:[#allocation6 + $0xe0] ss:$16 sps:$4 sm:$0xff]  }
  0x42   :  { %343 = vmatpush1.bf16.msra.mxu0 %v2329_v11  ;;  %456 = vmatpush1.bf16.msra.mxu1 %v2330_v12  ;;  %v2360_v32 = vld [vmem:[#allocation6 + $0xe8] ss:$16 sps:$4 sm:$0xff]   ;;  %v2879_v33 = vld [vmem:[#allocation8 + $0x4] ss:$16 sps:$4 sm:$0xff]   ;;  %v2881_v34 = vld [vmem:[#allocation8 + $0xc] ss:$16 sps:$4 sm:$0xff]  }
  0x43   :  { %344 = vmatprep.subr.bf16.mxu0 %v2331_v13  ;;  %457 = vmatprep.subr.bf16.mxu1 %v2333_v14  ;;  %v2361_v35 = vld [vmem:[#allocation3] sm:$0xff]   ;;  %v2889_v38 = vld [vmem:[#allocation8 + $0x8] ss:$16 sps:$4 sm:$0xff]   ;;  %v2891_v39 = vld [vmem:[#allocation8 + $0x2c] ss:$16 sps:$4 sm:$0xff]   ;;  %v111_v11 = vshrl.u32 %v110_v10, 7 }
  0x44   :  { %v2883_v36 = vld [vmem:[#allocation8] ss:$16 sps:$4 sm:$0xff]   ;;  %v2886_v37 = vld [vmem:[#allocation8 + $0x24] ss:$16 sps:$4 sm:$0xff]   ;;  %v2902_v42 = vld [vmem:[#allocation8 + $0x28] ss:$16 sps:$4 sm:$0xff]  }
  0x45   :  { %v2895_v40 = vld [vmem:[#allocation8 + $0x20] ss:$16 sps:$4 sm:$0xff]   ;;  %v2899_v41 = vld [vmem:[#allocation8 + $0x44] ss:$16 sps:$4 sm:$0xff]   ;;  %v2911_v46 = vld [vmem:[#allocation8 + $0x4c] ss:$16 sps:$4 sm:$0xff]  }
  0x46   :  { %345 = vmatpush1.bf16.msra.mxu0 %v2335_v15  ;;  %458 = vmatpush1.bf16.msra.mxu1 %v2336_v16  ;;  %v2906_v44 = vld [vmem:[#allocation8 + $0x40] ss:$16 sps:$4 sm:$0xff]   ;;  %v2908_v45 = vld [vmem:[#allocation8 + $0x64] ss:$16 sps:$4 sm:$0xff]   ;;  %v2914_v47 = vld [vmem:[#allocation8 + $0x48] ss:$16 sps:$4 sm:$0xff]  }
  0x47   :  { %346 = vmatprep.subr.bf16.mxu0 %v2337_v17  ;;  %459 = vmatprep.subr.bf16.mxu1 %v2339_v18  ;;  %v2916_v48 = vld [vmem:[#allocation8 + $0x6c] ss:$16 sps:$4 sm:$0xff]   ;;  %v2921_v49 = vld [vmem:[#allocation8 + $0x60] ss:$16 sps:$4 sm:$0xff]   ;;  %v2924_v50 = vld [vmem:[#allocation8 + $0x84] ss:$16 sps:$4 sm:$0xff]  }
  0x48   :  { %v2928_v51 = vld [vmem:[#allocation8 + $0x68] ss:$16 sps:$4 sm:$0xff]   ;;  %v2371_v52 = vld [vmem:[#allocation3 + $0x10] sm:$0xff]   ;;  %v2934_v54 = vld [vmem:[#allocation8 + $0x8c] ss:$16 sps:$4 sm:$0xff]   ;;  %v112_v12 = vsub.s32 0, %v111_v11 }
  0x49   :  { %v2931_v53 = vld [vmem:[#allocation8 + $0x80] ss:$16 sps:$4 sm:$0xff]   ;;  %v2937_v55 = vld [vmem:[#allocation8 + $0xa4] ss:$16 sps:$4 sm:$0xff]   ;;  %v2940_v56 = vld [vmem:[#allocation8 + $0x88] ss:$16 sps:$4 sm:$0xff]  }
  0x4a   :  { %347 = vmatpush1.bf16.msra.mxu0 %v2341_v19  ;;  %460 = vmatpush1.bf16.msra.mxu1 %v2342_v20  ;;  %v2942_v57 = vld [vmem:[#allocation8 + $0xac] ss:$16 sps:$4 sm:$0xff]   ;;  %v2947_v58 = vld [vmem:[#allocation8 + $0xa0] ss:$16 sps:$4 sm:$0xff]   ;;  %v2951_v59 = vld [vmem:[#allocation8 + $0xc4] ss:$16 sps:$4 sm:$0xff]  }
  0x4b   :  { %348 = vmatprep.subr.bf16.mxu0 %v2343_v21  ;;  %461 = vmatprep.subr.bf16.mxu1 %v2345_v22  ;;  %v2954_v60 = vld [vmem:[#allocation8 + $0xa8] ss:$16 sps:$4 sm:$0xff]   ;;  %v2958_v62 = vld [vmem:[#allocation8 + $0xc0] ss:$16 sps:$4 sm:$0xff]   ;;  %v2960_v63 = vld [vmem:[#allocation8 + $0xcc] ss:$16 sps:$4 sm:$0xff]  }
  0x4c   :  { %v2378_v61 = vld [vmem:[#allocation3 + $0x18] sm:$0xff]   ;;  %v2964_v1 = vld [vmem:[#allocation8 + $0xe4] ss:$16 sps:$4 sm:$0xff]   ;;  %v2974_v4 = vld [vmem:[#allocation8 + $0xe0] ss:$16 sps:$4 sm:$0xff]   ;;  %v116_v14 = vsub.s32 1, %v111_v11 }
  0x4d   :  { %v2966_v2 = vld [vmem:[#allocation8 + $0xc8] ss:$16 sps:$4 sm:$0xff]   ;;  %v2968_v3 = vld [vmem:[#allocation8 + $0xec] ss:$16 sps:$4 sm:$0xff]   ;;  %v2385_v6 = vld [vmem:[#allocation3 + $0x20] sm:$0xff]   ;;  %v124_v19 = vsub.s32 3, %v111_v11 }
  0x4e   :  { %349 = vmatpush1.bf16.msra.mxu0 %v2347_v23  ;;  %462 = vmatpush1.bf16.msra.mxu1 %v2348_v24  ;;  %v2978_v5 = vld [vmem:[#allocation8 + $0xe8] ss:$16 sps:$4 sm:$0xff]   ;;  %v2399_v8 = vld [vmem:[#allocation3 + $0x30] sm:$0xff]   ;;  %v108_v13 = vld [vmem:[%s3441_s3] sm:$0xf]  ;;  %s2807_s3 = smov [#allocation9]  }
  0x4f   :  { %350 = vmatprep.subr.bf16.mxu0 %v2349_v25  ;;  %463 = vmatprep.subr.bf16.mxu1 %v2351_v26  ;;  %v2392_v7 = vld [vmem:[#allocation3 + $0x28] sm:$0xff]   ;;  %v2407_v9 = vld [vmem:[#allocation3 + $0x38] sm:$0xff]   ;;  %v3032_v15 = vrot.slane %v108_v13, %v112_v12  ;;  %v3034_v16 = vrot.slane %v108_v13, %v116_v14  ;;  %s2041_s26 = sshll.u32 %s2807_s3, 4  ;;  %s2042_s26 = int_to_ptr.vmem [resolvable:$true] %s2041_s26 }
  0x50   :  { %s2771_s29 = scalar_lea.vmem %s2042_s26, 256  ;;  %p2776_p11 = scmp.lt.s32.totalorder %s2042_s26, %s2042_s26 }
  0x51   :  { %p2772_p10 = scmp.ne.s32.totalorder %s2042_s26, %s2771_s29  ;;  %p2777_p12 = scmp.lt.s32.totalorder %s2771_s29, %s2771_s29 }
  0x52   :  { %351 = vmatpush1.bf16.msra.mxu0 %v2353_v27  ;;  %464 = vmatpush1.bf16.msra.mxu1 %v2354_v28  ;;  %v120_v27 = vsub.s32 2, %v111_v11 }
  0x53   :  { %352 = vmatprep.subr.bf16.mxu0 %v2355_v29  ;;  %465 = vmatprep.subr.bf16.mxu1 %v2357_v30  ;;  %p2778_p13 = por %p2777_p12, %p2776_p11 }
  0x55   :  { %p2779_p0 = pnand %p2778_p13, %p2772_p10 }
  0x56   :  { %353 = vmatpush1.bf16.msra.mxu0 %v2359_v31  ;;  %466 = vmatpush1.bf16.msra.mxu1 %v2360_v32  ;;  %v3039_v32 = vrot.slane %v108_v13, %v124_v19 }
  0x57   :  { %828 = vmatprep.subr.bf16.mxu0 %v2879_v33  ;;  %871 = vmatprep.subr.bf16.mxu1 %v2881_v34 }
  0x59   :  { %371 = vmatmul.mubr.bf16.vlgmr.msra.gmra.mrb[0].mxu0 %v2361_v35  ;;  %484 = vmatmul.mubr.bf16.vlgmr.msra.gmra.mrb[0].mxu1 %v2361_v35 }
  0x5a   :  { %829 = vmatpush1.bf16.msra.mxu0 %v2883_v36  ;;  %380 = vmatprep.mubr.bf16.mxu0 %v2806_v0 }
  0x5b   :  { %493 = vmatprep.mubr.bf16.mxu1 %v2806_v0  ;;  %830 = vmatprep.subr.bf16.mxu0 %v2886_v37 }
  0x5c   :  { %872 = vmatpush1.bf16.msra.mxu1 %v2889_v38 }
  0x5d   :  { %873 = vmatprep.subr.bf16.mxu1 %v2891_v39 }
  0x5e   :  { %831 = vmatpush1.bf16.msra.mxu0 %v2895_v40 }
  0x5f   :  { %832 = vmatprep.subr.bf16.mxu0 %v2899_v41 }
  0x60   :  { %874 = vmatpush1.bf16.msra.mxu1 %v2902_v42 }
  0x61   :  { %381 = vmatmul.mubr.bf16.gmra.mrb[4].mxu0 %v2365_v43  ;;  %494 = vmatmul.mubr.bf16.gmra.mrb[4].mxu1 %v2365_v43 }
  0x62   :  { %390 = vmatprep.mubr.bf16.mxu0 %v2806_v0  ;;  %503 = vmatprep.mubr.bf16.mxu1 %v2806_v0 }
  0x63   :  { %833 = vmatpush1.bf16.msra.mxu0 %v2906_v44  ;;  %875 = vmatprep.subr.bf16.mxu1 %v2911_v46 }
  0x64   :  { %834 = vmatprep.subr.bf16.mxu0 %v2908_v45  ;;  %876 = vmatpush1.bf16.msra.mxu1 %v2914_v47 }
  0x65   :  { %877 = vmatprep.subr.bf16.mxu1 %v2916_v48 }
  0x67   :  { %835 = vmatpush1.bf16.msra.mxu0 %v2921_v49 }
  0x68   :  { %836 = vmatprep.subr.bf16.mxu0 %v2924_v50  ;;  %878 = vmatpush1.bf16.msra.mxu1 %v2928_v51 }
  0x69   :  { %391 = vmatmul.mubr.bf16.gmra.mrb[8].mxu0 %v2371_v52  ;;  %504 = vmatmul.mubr.bf16.gmra.mrb[8].mxu1 %v2371_v52 }
  0x6a   :  { %400 = vmatprep.mubr.bf16.mxu0 %v2806_v0  ;;  %513 = vmatprep.mubr.bf16.mxu1 %v2806_v0 }
  0x6b   :  { %837 = vmatpush1.bf16.msra.mxu0 %v2931_v53  ;;  %879 = vmatprep.subr.bf16.mxu1 %v2934_v54 }
  0x6c   :  { %838 = vmatprep.subr.bf16.mxu0 %v2937_v55  ;;  %880 = vmatpush1.bf16.msra.mxu1 %v2940_v56 }
  0x6d   :  { %881 = vmatprep.subr.bf16.mxu1 %v2942_v57 }
  0x6f   :  { %839 = vmatpush1.bf16.msra.mxu0 %v2947_v58 }
  0x70   :  { %840 = vmatprep.subr.bf16.mxu0 %v2951_v59  ;;  %882 = vmatpush1.bf16.msra.mxu1 %v2954_v60 }
  0x71   :  { %401 = vmatmul.mubr.bf16.gmra.mrb[12].mxu0 %v2378_v61  ;;  %514 = vmatmul.mubr.bf16.gmra.mrb[12].mxu1 %v2378_v61  ;;  %v3042_v61 = vrot.slane %v108_v13, %v120_v27 }
  0x72   :  { %410 = vmatprep.mubr.bf16.mxu0 %v2806_v0  ;;  %523 = vmatprep.mubr.bf16.mxu1 %v2806_v0 }
  0x73   :  { %841 = vmatpush1.bf16.msra.mxu0 %v2958_v62  ;;  %883 = vmatprep.subr.bf16.mxu1 %v2960_v63 }
  0x74   :  { %842 = vmatprep.subr.bf16.mxu0 %v2964_v1  ;;  %884 = vmatpush1.bf16.msra.mxu1 %v2966_v2 }
  0x75   :  { %885 = vmatprep.subr.bf16.mxu1 %v2968_v3 }
  0x77   :  { %843 = vmatpush1.bf16.msra.mxu0 %v2974_v4 }
  0x78   :  { %886 = vmatpush1.bf16.msra.mxu1 %v2978_v5  ;;  %980 = vmatprep.subr.bf16.mxu0 %v2879_v33 }
  0x79   :  { %411 = vmatmul.mubr.bf16.gmra.mrb[16].mxu0 %v2385_v6  ;;  %524 = vmatmul.mubr.bf16.gmra.mrb[16].mxu1 %v2385_v6 }
  0x7a   :  { %420 = vmatprep.mubr.bf16.mxu0 %v2806_v0  ;;  %533 = vmatprep.mubr.bf16.mxu1 %v2806_v0 }
  0x7b   :  { %1023 = vmatprep.subr.bf16.mxu1 %v2881_v34 }
  0x81   :  { %421 = vmatmul.mubr.bf16.gmra.mrb[20].mxu0 %v2392_v7  ;;  %534 = vmatmul.mubr.bf16.gmra.mrb[20].mxu1 %v2392_v7 }
  0x82   :  { %430 = vmatprep.mubr.bf16.mxu0 %v2806_v0  ;;  %543 = vmatprep.mubr.bf16.mxu1 %v2806_v0 }
  0x89   :  { %431 = vmatmul.mubr.bf16.gmra.mrb[24].mxu0 %v2399_v8  ;;  %544 = vmatmul.mubr.bf16.gmra.mrb[24].mxu1 %v2399_v8 }
  0x8a   :  { %440 = vmatprep.mubr.bf16.mxu0 %v2806_v0  ;;  %553 = vmatprep.mubr.bf16.mxu1 %v2806_v0 }
  0x91   :  { %441 = vmatmul.mubr.bf16.gmra.mrb[28].mxu0 %v2407_v9  ;;  %554 = vmatmul.mubr.bf16.gmra.mrb[28].mxu1 %v2407_v9 }
  0x92   :  { %860 = vmatprep.mubr.bf16.mxu0 %v2806_v0  ;;  %903 = vmatprep.mubr.bf16.mxu1 %v2806_v0 }
  0x99   :  { %861 = vmatmul.mubr.bf16.vlgmr.msra.gmra.mrb[0].mxu0 %v2806_v0  ;;  %904 = vmatmul.mubr.bf16.vlgmr.msra.gmra.mrb[0].mxu1 %v2806_v0 }
  0x9a   :  { %981 = vmatpush1.bf16.msra.mxu0 %v2883_v36  ;;  %1024 = vmatpush1.bf16.msra.mxu1 %v2889_v38 }
  0x9b   :  { %982 = vmatprep.subr.bf16.mxu0 %v2886_v37  ;;  %1025 = vmatprep.subr.bf16.mxu1 %v2891_v39 }
  0x9c   :  { %1012 = vmatprep.mubr.bf16.mxu0 %v2806_v0  ;;  %1055 = vmatprep.mubr.bf16.mxu1 %v2806_v0 }
  0x9e   :  { %983 = vmatpush1.bf16.msra.mxu0 %v2895_v40  ;;  %1026 = vmatpush1.bf16.msra.mxu1 %v2902_v42 }
  0x9f   :  { %984 = vmatprep.subr.bf16.mxu0 %v2899_v41  ;;  %1027 = vmatprep.subr.bf16.mxu1 %v2911_v46 }
  0xa2   :  { %985 = vmatpush1.bf16.msra.mxu0 %v2906_v44  ;;  %1028 = vmatpush1.bf16.msra.mxu1 %v2914_v47 }
  0xa3   :  { %986 = vmatprep.subr.bf16.mxu0 %v2908_v45  ;;  %1029 = vmatprep.subr.bf16.mxu1 %v2916_v48 }
  0xa6   :  { %987 = vmatpush1.bf16.msra.mxu0 %v2921_v49  ;;  %1030 = vmatpush1.bf16.msra.mxu1 %v2928_v51 }
  0xa7   :  { %988 = vmatprep.subr.bf16.mxu0 %v2924_v50  ;;  %1031 = vmatprep.subr.bf16.mxu1 %v2934_v54 }
  0xaa   :  { %989 = vmatpush1.bf16.msra.mxu0 %v2931_v53  ;;  %1032 = vmatpush1.bf16.msra.mxu1 %v2940_v56 }
  0xab   :  { %990 = vmatprep.subr.bf16.mxu0 %v2937_v55  ;;  %1033 = vmatprep.subr.bf16.mxu1 %v2942_v57 }
  0xae   :  { %991 = vmatpush1.bf16.msra.mxu0 %v2947_v58  ;;  %1034 = vmatpush1.bf16.msra.mxu1 %v2954_v60 }
  0xaf   :  { %992 = vmatprep.subr.bf16.mxu0 %v2951_v59  ;;  %1035 = vmatprep.subr.bf16.mxu1 %v2960_v63 }
  0xb2   :  { %993 = vmatpush1.bf16.msra.mxu0 %v2958_v62  ;;  %1036 = vmatpush1.bf16.msra.mxu1 %v2966_v2 }
  0xb3   :  { %994 = vmatprep.subr.bf16.mxu0 %v2964_v1  ;;  %1037 = vmatprep.subr.bf16.mxu1 %v2968_v3 }
  0xb6   :  { %995 = vmatpush1.bf16.msra.mxu0 %v2974_v4  ;;  %1038 = vmatpush1.bf16.msra.mxu1 %v2978_v5 }
  0xb7   :  { %1132 = vmatprep.subr.bf16.mxu0 %v2879_v33  ;;  %1175 = vmatprep.subr.bf16.mxu1 %v2881_v34 }
 0x16c   :  { %v862_v17 = vpop.f32.mrb[0].mxu0  ;;  %v905_v18 = vpop.f32.mrb[0].mxu1 }
 0x16d   :  { %v2174_v20 = vadd.f32 %v862_v17, %v3032_v15  ;;  %v864_v21 = vpop.f32.mrb[1].mxu0  ;;  %v907_v22 = vpop.f32.mrb[1].mxu1  ;;  %v2206_v7 = vadd.f32 %v905_v18, %v3042_v61 }
 0x16e   :  { %v2175_v23 = vadd.f32 %v864_v21, %v3034_v16  ;;  %v866_v24 = vpop.f32.mrb[2].mxu0  ;;  %v909_v25 = vpop.f32.mrb[2].mxu1  ;;  %v2207_v6 = vadd.f32 %v907_v22, %v3039_v32 }
 0x16f   :  { %v2126_v26 = vmul.f32 -1.442695, %v2174_v20  ;;  %v2176_v28 = vadd.f32 %v866_v24, %v3032_v15  ;;  %v868_v29 = vpop.f32.mrb[3].mxu0  ;;  %v911_v30 = vpop.f32.mrb[3].mxu1  ;;  %v2208_v10 = vadd.f32 %v909_v25, %v3042_v61 }
 0x170   :  { %v2128_v31 = vmul.f32 -1.442695, %v2175_v23  ;;  %v2177_v35 = vadd.f32 %v868_v29, %v3034_v16  ;;  %v2130_v8 = vmul.f32 -1.442695, %v2207_v6  ;;  %v2209_v9 = vadd.f32 %v911_v30, %v3039_v32 }
 0x171   :  { %2417 = vpow2.f32 %v2126_v26  ;;  %v2127_v43 = vmul.f32 -1.442695, %v2176_v28 }
 0x172   :  { %2419 = vpow2.f32 %v2128_v31  ;;  %v2129_v52 = vmul.f32 -1.442695, %v2177_v35  ;;  %v2131_v17 = vmul.f32 -1.442695, %v2209_v9 }
 0x173   :  { %2421 = vpow2.f32 %v2127_v43 }
 0x174   :  { %2423 = vpow2.f32 %v2129_v52 }
 0x175   :  { %2425 = vtanh.f32 %v2206_v7 }
 0x176   :  { %2427 = vpow2.f32 %v2130_v8 }
 0x177   :  { %2429 = vtanh.f32 %v2208_v10 }
 0x17b   :  { %v2418_v11 = vpop.eup %2417 }
 0x17c   :  { %v2420_v12 = vpop.eup %2419  ;;  %v928_v14 = vadd.f32 1.0, %v2418_v11 }
 0x17d   :  { %v940_v19 = vadd.f32 1.0, %v2420_v12  ;;  %v2422_v13 = vpop.eup %2421 }
 0x17e   :  { %2431 = vrcp.f32 %v928_v14  ;;  %v929_v20 = vadd.f32 1.0, %v2422_v13  ;;  %v2424_v21 = vpop.eup %2423 }
 0x17f   :  { %2433 = vrcp.f32 %v940_v19  ;;  %v941_v18 = vadd.f32 1.0, %v2424_v21  ;;  %v2426_v22 = vpop.eup %2425 }
 0x180   :  { %2435 = vpow2.f32 %v2131_v17  ;;  %v2428_v23 = vpop.eup %2427 }
 0x181   :  { %2437 = vrcp.f32 %v929_v20  ;;  %v2430_v24 = vpop.eup %2429  ;;  %v954_v31 = vadd.f32 1.0, %v2428_v23 }
 0x182   :  { %2439 = vrcp.f32 %v941_v18 }
 0x183   :  { %2441 = vrcp.f32 %v954_v31 }
 0x188   :  { %v2432_v25 = vpop.eup %2431 }
 0x189   :  { %v2434_v26 = vpop.eup %2433  ;;  %v962_v27 = vmul.f32 %v2432_v25, %v2426_v22 }
 0x18a   :  { %v2436_v28 = vpop.eup %2435  ;;  %v960_v29 = vmul.f32 0.0, %v2434_v26 }
 0x18b   :  { %v2438_v30 = vpop.eup %2437  ;;  %v955_v6 = vadd.f32 1.0, %v2436_v28 }
 0x18c   :  { %v3048_v35 = vadd.f32 %v962_v27, %v960_v29  ;;  %v963_v43 = vmul.f32 %v2438_v30, %v2430_v24  ;;  %v2440_v52 = vpop.eup %2439 }
 0x18d   :  { %v961_v7 = vmul.f32 0.0, %v2440_v52  ;;  %v2442_v9 = vpop.eup %2441 }
 0x18e   :  { %2443 = vtanh.f32 %v3048_v35 }
 0x18f   :  { %v3051_v8 = vadd.f32 %v963_v43, %v961_v7  ;;  %2445 = vrcp.f32 %v955_v6 }
 0x191   :  { %2447 = vtanh.f32 %v3051_v8 }
 0x198   :  { %v2444_v10 = vpop.eup %2443 }
 0x199   :  { %v2446_v11 = vpop.eup %2445  ;;  %v968_v14 = vmul.f32 %v2444_v10, %v2442_v9 }
 0x19b   :  { %v2448_v12 = vpop.eup %2447 }
 0x19c   :  { %v969_v17 = vmul.f32 %v2448_v12, %v2446_v11 }
 0x19e   :  { %v979_v19 = vpack.c.bf16 %v969_v17, %v968_v14 }
 0x1a0   :  { %1013 = vmatmul.mubr.bf16.vlgmr.msra.gmra.mrb[4].mxu0 %v979_v19  ;;  %1056 = vmatmul.mubr.bf16.vlgmr.msra.gmra.mrb[4].mxu1 %v979_v19 }
 0x1a1   :  { %1133 = vmatpush1.bf16.msra.mxu0 %v2883_v36  ;;  %1176 = vmatpush1.bf16.msra.mxu1 %v2889_v38 }
 0x1a2   :  { %1134 = vmatprep.subr.bf16.mxu0 %v2886_v37  ;;  %1177 = vmatprep.subr.bf16.mxu1 %v2891_v39 }
 0x1a3   :  { %1164 = vmatprep.mubr.bf16.mxu0 %v2806_v0  ;;  %1207 = vmatprep.mubr.bf16.mxu1 %v2806_v0 }
 0x1a5   :  { %1135 = vmatpush1.bf16.msra.mxu0 %v2895_v40  ;;  %1178 = vmatpush1.bf16.msra.mxu1 %v2902_v42 }
 0x1a6   :  { %1136 = vmatprep.subr.bf16.mxu0 %v2899_v41  ;;  %1179 = vmatprep.subr.bf16.mxu1 %v2911_v46 }
 0x1a9   :  { %1137 = vmatpush1.bf16.msra.mxu0 %v2906_v44  ;;  %1180 = vmatpush1.bf16.msra.mxu1 %v2914_v47 }
 0x1aa   :  { %1138 = vmatprep.subr.bf16.mxu0 %v2908_v45  ;;  %1181 = vmatprep.subr.bf16.mxu1 %v2916_v48 }
 0x1ad   :  { %1139 = vmatpush1.bf16.msra.mxu0 %v2921_v49  ;;  %1182 = vmatpush1.bf16.msra.mxu1 %v2928_v51 }
 0x1ae   :  { %1140 = vmatprep.subr.bf16.mxu0 %v2924_v50  ;;  %1183 = vmatprep.subr.bf16.mxu1 %v2934_v54 }
 0x1b1   :  { %1141 = vmatpush1.bf16.msra.mxu0 %v2931_v53  ;;  %1184 = vmatpush1.bf16.msra.mxu1 %v2940_v56 }
 0x1b2   :  { %1142 = vmatprep.subr.bf16.mxu0 %v2937_v55  ;;  %1185 = vmatprep.subr.bf16.mxu1 %v2942_v57 }
 0x1b5   :  { %1143 = vmatpush1.bf16.msra.mxu0 %v2947_v58  ;;  %1186 = vmatpush1.bf16.msra.mxu1 %v2954_v60 }
 0x1b6   :  { %1144 = vmatprep.subr.bf16.mxu0 %v2951_v59  ;;  %1187 = vmatprep.subr.bf16.mxu1 %v2960_v63 }
 0x1b9   :  { %1145 = vmatpush1.bf16.msra.mxu0 %v2958_v62  ;;  %1188 = vmatpush1.bf16.msra.mxu1 %v2966_v2 }
 0x1ba   :  { %1146 = vmatprep.subr.bf16.mxu0 %v2964_v1  ;;  %1189 = vmatprep.subr.bf16.mxu1 %v2968_v3 }
 0x1bd   :  { %1147 = vmatpush1.bf16.msra.mxu0 %v2974_v4  ;;  %1190 = vmatpush1.bf16.msra.mxu1 %v2978_v5 }
 0x1be   :  { %1284 = vmatprep.subr.bf16.mxu0 %v2879_v33  ;;  %1327 = vmatprep.subr.bf16.mxu1 %v2881_v34 }
 0x273   :  { %v1014_v13 = vpop.f32.mrb[4].mxu0  ;;  %v1057_v20 = vpop.f32.mrb[4].mxu1 }
 0x274   :  { %v2178_v21 = vadd.f32 %v1014_v13, %v3032_v15  ;;  %v1016_v18 = vpop.f32.mrb[5].mxu0  ;;  %v1059_v22 = vpop.f32.mrb[5].mxu1  ;;  %v2210_v7 = vadd.f32 %v1057_v20, %v3042_v61 }
 0x275   :  { %v2179_v23 = vadd.f32 %v1016_v18, %v3034_v16  ;;  %v1018_v24 = vpop.f32.mrb[6].mxu0  ;;  %v1061_v25 = vpop.f32.mrb[6].mxu1  ;;  %v2211_v6 = vadd.f32 %v1059_v22, %v3039_v32 }
 0x276   :  { %v2132_v26 = vmul.f32 -1.442695, %v2178_v21  ;;  %v2180_v27 = vadd.f32 %v1018_v24, %v3032_v15  ;;  %v1020_v28 = vpop.f32.mrb[7].mxu0  ;;  %v1063_v29 = vpop.f32.mrb[7].mxu1  ;;  %v2212_v11 = vadd.f32 %v1061_v25, %v3042_v61 }
 0x277   :  { %v2134_v30 = vmul.f32 -1.442695, %v2179_v23  ;;  %v2181_v31 = vadd.f32 %v1020_v28, %v3034_v16  ;;  %v2136_v9 = vmul.f32 -1.442695, %v2211_v6  ;;  %v2213_v10 = vadd.f32 %v1063_v29, %v3039_v32 }
 0x278   :  { %2449 = vpow2.f32 %v2132_v26  ;;  %v2133_v43 = vmul.f32 -1.442695, %v2180_v27 }
 0x279   :  { %2451 = vpow2.f32 %v2134_v30  ;;  %v2135_v52 = vmul.f32 -1.442695, %v2181_v31  ;;  %v2137_v19 = vmul.f32 -1.442695, %v2213_v10 }
 0x27a   :  { %2453 = vpow2.f32 %v2133_v43 }
 0x27b   :  { %2455 = vpow2.f32 %v2135_v52 }
 0x27c   :  { %2457 = vtanh.f32 %v2210_v7 }
 0x27d   :  { %2459 = vpow2.f32 %v2136_v9 }
 0x27e   :  { %2461 = vtanh.f32 %v2212_v11 }
 0x282   :  { %v2450_v12 = vpop.eup %2449 }
 0x283   :  { %v2452_v14 = vpop.eup %2451  ;;  %v1080_v17 = vadd.f32 1.0, %v2450_v12 }
 0x284   :  { %v1092_v13 = vadd.f32 1.0, %v2452_v14  ;;  %v2454_v21 = vpop.eup %2453 }
 0x285   :  { %2463 = vrcp.f32 %v1080_v17  ;;  %v1081_v18 = vadd.f32 1.0, %v2454_v21  ;;  %v2456_v22 = vpop.eup %2455 }
 0x286   :  { %2465 = vrcp.f32 %v1092_v13  ;;  %v1093_v20 = vadd.f32 1.0, %v2456_v22  ;;  %v2458_v23 = vpop.eup %2457 }
 0x287   :  { %2467 = vpow2.f32 %v2137_v19  ;;  %v2460_v24 = vpop.eup %2459 }
 0x288   :  { %2469 = vrcp.f32 %v1081_v18  ;;  %v2462_v25 = vpop.eup %2461  ;;  %v1106_v43 = vadd.f32 1.0, %v2460_v24 }
 0x289   :  { %2471 = vrcp.f32 %v1093_v20 }
 0x28a   :  { %2473 = vrcp.f32 %v1106_v43 }
 0x28f   :  { %v2464_v26 = vpop.eup %2463 }
 0x290   :  { %v2466_v27 = vpop.eup %2465  ;;  %v1114_v28 = vmul.f32 %v2464_v26, %v2458_v23 }
 0x291   :  { %v2468_v29 = vpop.eup %2467  ;;  %v1112_v30 = vmul.f32 %v2466_v27, %v3048_v35 }
 0x292   :  { %v2470_v31 = vpop.eup %2469  ;;  %v1107_v9 = vadd.f32 1.0, %v2468_v29 }
 0x293   :  { %v3097_v52 = vadd.f32 %v1114_v28, %v1112_v30  ;;  %v1115_v6 = vmul.f32 %v2470_v31, %v2462_v25  ;;  %v2472_v7 = vpop.eup %2471 }
 0x294   :  { %v1113_v10 = vmul.f32 %v2472_v7, %v3051_v8  ;;  %v2474_v12 = vpop.eup %2473 }
 0x295   :  { %2475 = vtanh.f32 %v3097_v52 }
 0x296   :  { %v3101_v11 = vadd.f32 %v1115_v6, %v1113_v10  ;;  %2477 = vrcp.f32 %v1107_v9 }
 0x298   :  { %2479 = vtanh.f32 %v3101_v11 }
 0x29f   :  { %v2476_v14 = vpop.eup %2475 }
 0x2a0   :  { %v2478_v35 = vpop.eup %2477  ;;  %v1120_v19 = vmul.f32 %v2476_v14, %v2474_v12 }
 0x2a2   :  { %v2480_v17 = vpop.eup %2479 }
 0x2a3   :  { %v1121_v13 = vmul.f32 %v2480_v17, %v2478_v35 }
 0x2a5   :  { %v1131_v21 = vpack.c.bf16 %v1121_v13, %v1120_v19 }
 0x2a7   :  { %1165 = vmatmul.mubr.bf16.vlgmr.msra.gmra.mrb[8].mxu0 %v1131_v21  ;;  %1208 = vmatmul.mubr.bf16.vlgmr.msra.gmra.mrb[8].mxu1 %v1131_v21 }
 0x2a8   :  { %1285 = vmatpush1.bf16.msra.mxu0 %v2883_v36  ;;  %1328 = vmatpush1.bf16.msra.mxu1 %v2889_v38 }
 0x2a9   :  { %1286 = vmatprep.subr.bf16.mxu0 %v2886_v37  ;;  %1329 = vmatprep.subr.bf16.mxu1 %v2891_v39 }
 0x2aa   :  { %1316 = vmatprep.mubr.bf16.mxu0 %v2806_v0  ;;  %1359 = vmatprep.mubr.bf16.mxu1 %v2806_v0 }
 0x2ac   :  { %1287 = vmatpush1.bf16.msra.mxu0 %v2895_v40  ;;  %1330 = vmatpush1.bf16.msra.mxu1 %v2902_v42 }
 0x2ad   :  { %1288 = vmatprep.subr.bf16.mxu0 %v2899_v41  ;;  %1331 = vmatprep.subr.bf16.mxu1 %v2911_v46 }
 0x2b0   :  { %1289 = vmatpush1.bf16.msra.mxu0 %v2906_v44  ;;  %1332 = vmatpush1.bf16.msra.mxu1 %v2914_v47 }
 0x2b1   :  { %1290 = vmatprep.subr.bf16.mxu0 %v2908_v45  ;;  %1333 = vmatprep.subr.bf16.mxu1 %v2916_v48 }
 0x2b4   :  { %1291 = vmatpush1.bf16.msra.mxu0 %v2921_v49  ;;  %1334 = vmatpush1.bf16.msra.mxu1 %v2928_v51 }
 0x2b5   :  { %1292 = vmatprep.subr.bf16.mxu0 %v2924_v50  ;;  %1335 = vmatprep.subr.bf16.mxu1 %v2934_v54 }
 0x2b8   :  { %1293 = vmatpush1.bf16.msra.mxu0 %v2931_v53  ;;  %1336 = vmatpush1.bf16.msra.mxu1 %v2940_v56 }
 0x2b9   :  { %1294 = vmatprep.subr.bf16.mxu0 %v2937_v55  ;;  %1337 = vmatprep.subr.bf16.mxu1 %v2942_v57 }
 0x2bc   :  { %1295 = vmatpush1.bf16.msra.mxu0 %v2947_v58  ;;  %1338 = vmatpush1.bf16.msra.mxu1 %v2954_v60 }
 0x2bd   :  { %1296 = vmatprep.subr.bf16.mxu0 %v2951_v59  ;;  %1339 = vmatprep.subr.bf16.mxu1 %v2960_v63 }
 0x2c0   :  { %1297 = vmatpush1.bf16.msra.mxu0 %v2958_v62  ;;  %1340 = vmatpush1.bf16.msra.mxu1 %v2966_v2 }
 0x2c1   :  { %1298 = vmatprep.subr.bf16.mxu0 %v2964_v1  ;;  %1341 = vmatprep.subr.bf16.mxu1 %v2968_v3 }
 0x2c4   :  { %1299 = vmatpush1.bf16.msra.mxu0 %v2974_v4  ;;  %1342 = vmatpush1.bf16.msra.mxu1 %v2978_v5 }
 0x2c5   :  { %1436 = vmatprep.subr.bf16.mxu0 %v2879_v33  ;;  %1479 = vmatprep.subr.bf16.mxu1 %v2881_v34 }
 0x37a   :  { %v1166_v8 = vpop.f32.mrb[8].mxu0  ;;  %v1209_v18 = vpop.f32.mrb[8].mxu1 }
 0x37b   :  { %v2182_v22 = vadd.f32 %v1166_v8, %v3032_v15  ;;  %v1168_v20 = vpop.f32.mrb[9].mxu0  ;;  %v1211_v23 = vpop.f32.mrb[9].mxu1  ;;  %v2214_v10 = vadd.f32 %v1209_v18, %v3042_v61 }
 0x37c   :  { %v2183_v24 = vadd.f32 %v1168_v20, %v3034_v16  ;;  %v1170_v25 = vpop.f32.mrb[10].mxu0  ;;  %v1213_v26 = vpop.f32.mrb[10].mxu1  ;;  %v2215_v9 = vadd.f32 %v1211_v23, %v3039_v32 }
 0x37d   :  { %v2138_v27 = vmul.f32 -1.442695, %v2182_v22  ;;  %v2184_v28 = vadd.f32 %v1170_v25, %v3032_v15  ;;  %v1172_v29 = vpop.f32.mrb[11].mxu0  ;;  %v1215_v30 = vpop.f32.mrb[11].mxu1  ;;  %v2216_v35 = vadd.f32 %v1213_v26, %v3042_v61 }
 0x37e   :  { %v2140_v31 = vmul.f32 -1.442695, %v2183_v24  ;;  %v2185_v43 = vadd.f32 %v1172_v29, %v3034_v16  ;;  %v2142_v12 = vmul.f32 -1.442695, %v2215_v9  ;;  %v2217_v14 = vadd.f32 %v1215_v30, %v3039_v32 }
 0x37f   :  { %2481 = vpow2.f32 %v2138_v27  ;;  %v2139_v6 = vmul.f32 -1.442695, %v2184_v28 }
 0x380   :  { %2483 = vpow2.f32 %v2140_v31  ;;  %v2141_v7 = vmul.f32 -1.442695, %v2185_v43  ;;  %v2143_v21 = vmul.f32 -1.442695, %v2217_v14 }
 0x381   :  { %2485 = vpow2.f32 %v2139_v6 }
 0x382   :  { %2487 = vpow2.f32 %v2141_v7 }
 0x383   :  { %2489 = vtanh.f32 %v2214_v10 }
 0x384   :  { %2491 = vpow2.f32 %v2142_v12 }
 0x385   :  { %2493 = vtanh.f32 %v2216_v35 }
 0x389   :  { %v2482_v17 = vpop.eup %2481 }
 0x38a   :  { %v2484_v19 = vpop.eup %2483  ;;  %v1232_v13 = vadd.f32 1.0, %v2482_v17 }
 0x38b   :  { %v1244_v8 = vadd.f32 1.0, %v2484_v19  ;;  %v2486_v22 = vpop.eup %2485 }
 0x38c   :  { %2495 = vrcp.f32 %v1232_v13  ;;  %v1233_v20 = vadd.f32 1.0, %v2486_v22  ;;  %v2488_v23 = vpop.eup %2487 }
 0x38d   :  { %2497 = vrcp.f32 %v1244_v8  ;;  %v1245_v18 = vadd.f32 1.0, %v2488_v23  ;;  %v2490_v24 = vpop.eup %2489 }
 0x38e   :  { %2499 = vpow2.f32 %v2143_v21  ;;  %v2492_v25 = vpop.eup %2491 }
 0x38f   :  { %2501 = vrcp.f32 %v1233_v20  ;;  %v2494_v26 = vpop.eup %2493  ;;  %v1258_v6 = vadd.f32 1.0, %v2492_v25 }
 0x390   :  { %2503 = vrcp.f32 %v1245_v18 }
 0x391   :  { %2505 = vrcp.f32 %v1258_v6 }
 0x396   :  { %v2496_v27 = vpop.eup %2495 }
 0x397   :  { %v2498_v28 = vpop.eup %2497  ;;  %v1266_v29 = vmul.f32 %v2496_v27, %v2490_v24 }
 0x398   :  { %v2500_v30 = vpop.eup %2499  ;;  %v1264_v31 = vmul.f32 %v2498_v28, %v3097_v52 }
 0x399   :  { %v2502_v43 = vpop.eup %2501  ;;  %v1259_v12 = vadd.f32 1.0, %v2500_v30 }
 0x39a   :  { %v3147_v7 = vadd.f32 %v1266_v29, %v1264_v31  ;;  %v1267_v9 = vmul.f32 %v2502_v43, %v2494_v26  ;;  %v2504_v10 = vpop.eup %2503 }
 0x39b   :  { %v1265_v14 = vmul.f32 %v2504_v10, %v3101_v11  ;;  %v2506_v17 = vpop.eup %2505 }
 0x39c   :  { %2507 = vtanh.f32 %v3147_v7 }
 0x39d   :  { %v3151_v35 = vadd.f32 %v1267_v9, %v1265_v14  ;;  %2509 = vrcp.f32 %v1259_v12 }
 0x39f   :  { %2511 = vtanh.f32 %v3151_v35 }
 0x3a6   :  { %v2508_v19 = vpop.eup %2507 }
 0x3a7   :  { %v2510_v52 = vpop.eup %2509  ;;  %v1272_v21 = vmul.f32 %v2508_v19, %v2506_v17 }
 0x3a9   :  { %v2512_v13 = vpop.eup %2511 }
 0x3aa   :  { %v1273_v8 = vmul.f32 %v2512_v13, %v2510_v52 }
 0x3ac   :  { %v1283_v22 = vpack.c.bf16 %v1273_v8, %v1272_v21 }
 0x3ae   :  { %1317 = vmatmul.mubr.bf16.vlgmr.msra.gmra.mrb[12].mxu0 %v1283_v22  ;;  %1360 = vmatmul.mubr.bf16.vlgmr.msra.gmra.mrb[12].mxu1 %v1283_v22 }
 0x3af   :  { %1437 = vmatpush1.bf16.msra.mxu0 %v2883_v36  ;;  %1480 = vmatpush1.bf16.msra.mxu1 %v2889_v38 }
 0x3b0   :  { %1438 = vmatprep.subr.bf16.mxu0 %v2886_v37  ;;  %1481 = vmatprep.subr.bf16.mxu1 %v2891_v39 }
 0x3b1   :  { %1468 = vmatprep.mubr.bf16.mxu0 %v2806_v0  ;;  %1511 = vmatprep.mubr.bf16.mxu1 %v2806_v0 }
 0x3b3   :  { %1439 = vmatpush1.bf16.msra.mxu0 %v2895_v40  ;;  %1482 = vmatpush1.bf16.msra.mxu1 %v2902_v42 }
 0x3b4   :  { %1440 = vmatprep.subr.bf16.mxu0 %v2899_v41  ;;  %1483 = vmatprep.subr.bf16.mxu1 %v2911_v46 }
 0x3b7   :  { %1441 = vmatpush1.bf16.msra.mxu0 %v2906_v44  ;;  %1484 = vmatpush1.bf16.msra.mxu1 %v2914_v47 }
 0x3b8   :  { %1442 = vmatprep.subr.bf16.mxu0 %v2908_v45  ;;  %1485 = vmatprep.subr.bf16.mxu1 %v2916_v48 }
 0x3bb   :  { %1443 = vmatpush1.bf16.msra.mxu0 %v2921_v49  ;;  %1486 = vmatpush1.bf16.msra.mxu1 %v2928_v51 }
 0x3bc   :  { %1444 = vmatprep.subr.bf16.mxu0 %v2924_v50  ;;  %1487 = vmatprep.subr.bf16.mxu1 %v2934_v54 }
 0x3bf   :  { %1445 = vmatpush1.bf16.msra.mxu0 %v2931_v53  ;;  %1488 = vmatpush1.bf16.msra.mxu1 %v2940_v56 }
 0x3c0   :  { %1446 = vmatprep.subr.bf16.mxu0 %v2937_v55  ;;  %1489 = vmatprep.subr.bf16.mxu1 %v2942_v57 }
 0x3c3   :  { %1447 = vmatpush1.bf16.msra.mxu0 %v2947_v58  ;;  %1490 = vmatpush1.bf16.msra.mxu1 %v2954_v60 }
 0x3c4   :  { %1448 = vmatprep.subr.bf16.mxu0 %v2951_v59  ;;  %1491 = vmatprep.subr.bf16.mxu1 %v2960_v63 }
 0x3c7   :  { %1449 = vmatpush1.bf16.msra.mxu0 %v2958_v62  ;;  %1492 = vmatpush1.bf16.msra.mxu1 %v2966_v2 }
 0x3c8   :  { %1450 = vmatprep.subr.bf16.mxu0 %v2964_v1  ;;  %1493 = vmatprep.subr.bf16.mxu1 %v2968_v3 }
 0x3cb   :  { %1451 = vmatpush1.bf16.msra.mxu0 %v2974_v4  ;;  %1494 = vmatpush1.bf16.msra.mxu1 %v2978_v5 }
 0x3cc   :  { %1588 = vmatprep.subr.bf16.mxu0 %v2879_v33  ;;  %1631 = vmatprep.subr.bf16.mxu1 %v2881_v34 }
 0x481   :  { %v1318_v36 = vpop.f32.mrb[12].mxu0  ;;  %v1361_v37 = vpop.f32.mrb[12].mxu1 }
 0x482   :  { %v2186_v38 = vadd.f32 %v1318_v36, %v3032_v15  ;;  %v1320_v39 = vpop.f32.mrb[13].mxu0  ;;  %v1363_v40 = vpop.f32.mrb[13].mxu1  ;;  %v2218_v53 = vadd.f32 %v1361_v37, %v3042_v61 }
 0x483   :  { %v2187_v41 = vadd.f32 %v1320_v39, %v3034_v16  ;;  %v1322_v42 = vpop.f32.mrb[14].mxu0  ;;  %v1365_v44 = vpop.f32.mrb[14].mxu1  ;;  %v2219_v51 = vadd.f32 %v1363_v40, %v3039_v32 }
 0x484   :  { %v2144_v45 = vmul.f32 -1.442695, %v2186_v38  ;;  %v2188_v46 = vadd.f32 %v1322_v42, %v3032_v15  ;;  %v1324_v47 = vpop.f32.mrb[15].mxu0  ;;  %v1367_v48 = vpop.f32.mrb[15].mxu1  ;;  %v2220_v11 = vadd.f32 %v1365_v44, %v3042_v61  ;;  %v3204_v44 = vld [vmem:[#allocation8] ss:$16 sps:$4 sm:$0xff]  }
 0x485   :  { %v2146_v49 = vmul.f32 -1.442695, %v2187_v41  ;;  %v2189_v33 = vadd.f32 %v1324_v47, %v3034_v16  ;;  %v2148_v54 = vmul.f32 -1.442695, %v2219_v51  ;;  %v2221_v55 = vadd.f32 %v1367_v48, %v3039_v32  ;;  %v3218_v47 = vld [vmem:[#allocation8 + $0x20] ss:$16 sps:$4 sm:$0xff]  }
 0x486   :  { %2513 = vpow2.f32 %v2144_v45  ;;  %v2145_v34 = vmul.f32 -1.442695, %v2188_v46  ;;  %v3210_v45 = vld [vmem:[#allocation8 + $0x24] ss:$16 sps:$4 sm:$0xff]   ;;  %v3213_v46 = vld [vmem:[#allocation8 + $0x2c] ss:$16 sps:$4 sm:$0xff]  }
 0x487   :  { %2515 = vpow2.f32 %v2146_v49  ;;  %v2147_v50 = vmul.f32 -1.442695, %v2189_v33  ;;  %v2149_v24 = vmul.f32 -1.442695, %v2221_v55  ;;  %v3221_v48 = vld [vmem:[#allocation8 + $0x28] ss:$16 sps:$4 sm:$0xff]  }
 0x488   :  { %2517 = vpow2.f32 %v2145_v34  ;;  %v3224_v49 = vld [vmem:[#allocation8 + $0x44] ss:$16 sps:$4 sm:$0xff]   ;;  %v3227_v33 = vld [vmem:[#allocation8 + $0x4c] ss:$16 sps:$4 sm:$0xff]   ;;  %v3230_v34 = vld [vmem:[#allocation8 + $0x40] ss:$16 sps:$4 sm:$0xff]  }
 0x489   :  { %2519 = vpow2.f32 %v2147_v50  ;;  %v3233_v50 = vld [vmem:[#allocation8 + $0x48] ss:$16 sps:$4 sm:$0xff]   ;;  %v3236_v51 = vld [vmem:[#allocation8 + $0x64] ss:$16 sps:$4 sm:$0xff]  }
 0x48a   :  { %2521 = vtanh.f32 %v2218_v53  ;;  %v3239_v53 = vld [vmem:[#allocation8 + $0x6c] ss:$16 sps:$4 sm:$0xff]   ;;  %v3245_v55 = vld [vmem:[#allocation8 + $0x68] ss:$16 sps:$4 sm:$0xff]  }
 0x48b   :  { %2523 = vpow2.f32 %v2148_v54  ;;  %v3242_v54 = vld [vmem:[#allocation8 + $0x60] ss:$16 sps:$4 sm:$0xff]  }
 0x48c   :  { %2525 = vtanh.f32 %v2220_v11  ;;  %v3248_v11 = vld [vmem:[#allocation8 + $0x84] ss:$16 sps:$4 sm:$0xff]  }
 0x490   :  { %v2514_v20 = vpop.eup %2513 }
 0x491   :  { %v2516_v23 = vpop.eup %2515  ;;  %v1384_v18 = vadd.f32 1.0, %v2514_v20  ;;  %v3251_v20 = vld [vmem:[#allocation8 + $0x8c] ss:$16 sps:$4 sm:$0xff]  }
 0x492   :  { %v1396_v25 = vadd.f32 1.0, %v2516_v23  ;;  %v2518_v26 = vpop.eup %2517  ;;  %v3254_v23 = vld [vmem:[#allocation8 + $0x80] ss:$16 sps:$4 sm:$0xff]  }
 0x493   :  { %2527 = vrcp.f32 %v1384_v18  ;;  %v1385_v27 = vadd.f32 1.0, %v2518_v26  ;;  %v2520_v28 = vpop.eup %2519  ;;  %v3258_v18 = vld [vmem:[#allocation8 + $0xa4] ss:$16 sps:$4 sm:$0xff]  }
 0x494   :  { %2529 = vrcp.f32 %v1396_v25  ;;  %v1397_v29 = vadd.f32 1.0, %v2520_v28  ;;  %v2522_v30 = vpop.eup %2521 }
 0x495   :  { %2531 = vpow2.f32 %v2149_v24  ;;  %v2524_v31 = vpop.eup %2523 }
 0x496   :  { %2533 = vrcp.f32 %v1385_v27  ;;  %v2526_v43 = vpop.eup %2525  ;;  %v1410_v19 = vadd.f32 1.0, %v2524_v31 }
 0x497   :  { %2535 = vrcp.f32 %v1397_v29 }
 0x498   :  { %2537 = vrcp.f32 %v1410_v19 }
 0x49d   :  { %v2528_v6 = vpop.eup %2527 }
 0x49e   :  { %v2530_v9 = vpop.eup %2529  ;;  %v1418_v10 = vmul.f32 %v2528_v6, %v2522_v30 }
 0x49f   :  { %v2532_v12 = vpop.eup %2531  ;;  %v1416_v14 = vmul.f32 %v2530_v9, %v3147_v7 }
 0x4a0   :  { %v2534_v17 = vpop.eup %2533  ;;  %v1411_v8 = vadd.f32 1.0, %v2532_v12 }
 0x4a1   :  { %v3197_v52 = vadd.f32 %v1418_v10, %v1416_v14  ;;  %v1419_v13 = vmul.f32 %v2534_v17, %v2526_v43  ;;  %v2536_v21 = vpop.eup %2535 }
 0x4a2   :  { %v1417_v22 = vmul.f32 %v2536_v21, %v3151_v35  ;;  %v2538_v37 = vpop.eup %2537  ;;  %v3207_v35 = vld [vmem:[#allocation8 + $0x8] ss:$16 sps:$4 sm:$0xff]  }
 0x4a3   :  { %2539 = vtanh.f32 %v3197_v52 }
 0x4a4   :  { %v3201_v36 = vadd.f32 %v1419_v13, %v1417_v22  ;;  %2541 = vrcp.f32 %v1411_v8 }
 0x4a6   :  { %2543 = vtanh.f32 %v3201_v36 }
 0x4ad   :  { %v2540_v38 = vpop.eup %2539 }
 0x4ae   :  { %v2542_v7 = vpop.eup %2541  ;;  %v1424_v40 = vmul.f32 %v2540_v38, %v2538_v37 }
 0x4b0   :  { %v2544_v39 = vpop.eup %2543 }
 0x4b1   :  { %v1425_v41 = vmul.f32 %v2544_v39, %v2542_v7 }
 0x4b3   :  { %v1435_v42 = vpack.c.bf16 %v1425_v41, %v1424_v40 }
 0x4b5   :  { %1469 = vmatmul.mubr.bf16.vlgmr.msra.gmra.mrb[16].mxu0 %v1435_v42  ;;  %1512 = vmatmul.mubr.bf16.vlgmr.msra.gmra.mrb[16].mxu1 %v1435_v42 }
 0x4b6   :  { %1589 = vmatpush1.bf16.msra.mxu0 %v3204_v44  ;;  %1632 = vmatpush1.bf16.msra.mxu1 %v3207_v35 }
 0x4b7   :  { %1590 = vmatprep.subr.bf16.mxu0 %v3210_v45  ;;  %1633 = vmatprep.subr.bf16.mxu1 %v3213_v46 }
 0x4b8   :  { %1620 = vmatprep.mubr.bf16.mxu0 %v2806_v0  ;;  %1663 = vmatprep.mubr.bf16.mxu1 %v2806_v0 }
 0x4ba   :  { %1591 = vmatpush1.bf16.msra.mxu0 %v3218_v47  ;;  %1634 = vmatpush1.bf16.msra.mxu1 %v3221_v48 }
 0x4bb   :  { %1592 = vmatprep.subr.bf16.mxu0 %v3224_v49  ;;  %1635 = vmatprep.subr.bf16.mxu1 %v3227_v33 }
 0x4be   :  { %1593 = vmatpush1.bf16.msra.mxu0 %v3230_v34  ;;  %1636 = vmatpush1.bf16.msra.mxu1 %v3233_v50 }
 0x4bf   :  { %1594 = vmatprep.subr.bf16.mxu0 %v3236_v51  ;;  %1637 = vmatprep.subr.bf16.mxu1 %v3239_v53 }
 0x4c2   :  { %1595 = vmatpush1.bf16.msra.mxu0 %v3242_v54  ;;  %1638 = vmatpush1.bf16.msra.mxu1 %v3245_v55 }
 0x4c3   :  { %1596 = vmatprep.subr.bf16.mxu0 %v3248_v11  ;;  %1639 = vmatprep.subr.bf16.mxu1 %v3251_v20 }
 0x4c6   :  { %1597 = vmatpush1.bf16.msra.mxu0 %v3254_v23  ;;  %1640 = vmatpush1.bf16.msra.mxu1 %v2940_v56  ;;  %v3272_v56 = vld [vmem:[#allocation8 + $0x4] ss:$16 sps:$4 sm:$0xff]  }
 0x4c7   :  { %1598 = vmatprep.subr.bf16.mxu0 %v3258_v18  ;;  %1641 = vmatprep.subr.bf16.mxu1 %v2942_v57  ;;  %v3275_v57 = vld [vmem:[#allocation8 + $0xc] ss:$16 sps:$4 sm:$0xff]  }
 0x4ca   :  { %1599 = vmatpush1.bf16.msra.mxu0 %v2947_v58  ;;  %1642 = vmatpush1.bf16.msra.mxu1 %v2954_v60 }
 0x4cb   :  { %1600 = vmatprep.subr.bf16.mxu0 %v2951_v59  ;;  %1643 = vmatprep.subr.bf16.mxu1 %v2960_v63 }
 0x4ce   :  { %1601 = vmatpush1.bf16.msra.mxu0 %v2958_v62  ;;  %1644 = vmatpush1.bf16.msra.mxu1 %v2966_v2 }
 0x4cf   :  { %1602 = vmatprep.subr.bf16.mxu0 %v2964_v1  ;;  %1645 = vmatprep.subr.bf16.mxu1 %v2968_v3 }
 0x4d2   :  { %1603 = vmatpush1.bf16.msra.mxu0 %v2974_v4  ;;  %1646 = vmatpush1.bf16.msra.mxu1 %v2978_v5 }
 0x4d3   :  { %1740 = vmatprep.subr.bf16.mxu0 %v3272_v56  ;;  %1783 = vmatprep.subr.bf16.mxu1 %v3275_v57 }
 0x588   :  { %v1470_v58 = vpop.f32.mrb[16].mxu0  ;;  %v1513_v59 = vpop.f32.mrb[16].mxu1 }
 0x589   :  { %v2190_v60 = vadd.f32 %v1470_v58, %v3032_v15  ;;  %v1472_v62 = vpop.f32.mrb[17].mxu0  ;;  %v1515_v63 = vpop.f32.mrb[17].mxu1  ;;  %v2222_v31 = vadd.f32 %v1513_v59, %v3042_v61 }
 0x58a   :  { %v2191_v1 = vadd.f32 %v1472_v62, %v3034_v16  ;;  %v1474_v2 = vpop.f32.mrb[18].mxu0  ;;  %v1517_v3 = vpop.f32.mrb[18].mxu1  ;;  %v2223_v30 = vadd.f32 %v1515_v63, %v3039_v32 }
 0x58b   :  { %v2150_v4 = vmul.f32 -1.442695, %v2190_v60  ;;  %v2192_v5 = vadd.f32 %v1474_v2, %v3032_v15  ;;  %v1476_v24 = vpop.f32.mrb[19].mxu0  ;;  %v1519_v25 = vpop.f32.mrb[19].mxu1  ;;  %v2224_v9 = vadd.f32 %v1517_v3, %v3042_v61 }
 0x58c   :  { %v2152_v26 = vmul.f32 -1.442695, %v2191_v1  ;;  %v2193_v27 = vadd.f32 %v1476_v24, %v3034_v16  ;;  %v2154_v43 = vmul.f32 -1.442695, %v2223_v30  ;;  %v2225_v6 = vadd.f32 %v1519_v25, %v3039_v32  ;;  %v3320_v30 = vld [vmem:[#allocation8 + $0xa0] ss:$16 sps:$4 sm:$0xff]  }
 0x58d   :  { %2545 = vpow2.f32 %v2150_v4  ;;  %v2151_v28 = vmul.f32 -1.442695, %v2192_v5 }
 0x58e   :  { %2547 = vpow2.f32 %v2152_v26  ;;  %v2153_v29 = vmul.f32 -1.442695, %v2193_v27  ;;  %v2155_v17 = vmul.f32 -1.442695, %v2225_v6  ;;  %v3329_v6 = vld [vmem:[#allocation8 + $0xcc] ss:$16 sps:$4 sm:$0xff]  }
 0x58f   :  { %2549 = vpow2.f32 %v2151_v28 }
 0x590   :  { %2551 = vpow2.f32 %v2153_v29  ;;  %v3317_v29 = vld [vmem:[#allocation8 + $0xac] ss:$16 sps:$4 sm:$0xff]  }
 0x591   :  { %2553 = vtanh.f32 %v2222_v31  ;;  %v3323_v31 = vld [vmem:[#allocation8 + $0xa8] ss:$16 sps:$4 sm:$0xff]  }
 0x592   :  { %2555 = vpow2.f32 %v2154_v43  ;;  %v3326_v43 = vld [vmem:[#allocation8 + $0xc4] ss:$16 sps:$4 sm:$0xff]  }
 0x593   :  { %2557 = vtanh.f32 %v2224_v9  ;;  %v3332_v9 = vld [vmem:[#allocation8 + $0xc0] ss:$16 sps:$4 sm:$0xff]  }
 0x597   :  { %v2546_v10 = vpop.eup %2545 }
 0x598   :  { %v2548_v12 = vpop.eup %2547  ;;  %v1536_v14 = vadd.f32 1.0, %v2546_v10  ;;  %v3335_v10 = vld [vmem:[#allocation8 + $0xc8] ss:$16 sps:$4 sm:$0xff]  }
 0x599   :  { %v1548_v19 = vadd.f32 1.0, %v2548_v12  ;;  %v2550_v13 = vpop.eup %2549  ;;  %v3338_v12 = vld [vmem:[#allocation8 + $0xe4] ss:$16 sps:$4 sm:$0xff]  }
 0x59a   :  { %2559 = vrcp.f32 %v1536_v14  ;;  %v1537_v21 = vadd.f32 1.0, %v2550_v13  ;;  %v2552_v8 = vpop.eup %2551  ;;  %v3341_v14 = vld [vmem:[#allocation8 + $0xec] ss:$16 sps:$4 sm:$0xff]  }
 0x59b   :  { %2561 = vrcp.f32 %v1548_v19  ;;  %v1549_v22 = vadd.f32 1.0, %v2552_v8  ;;  %v2554_v37 = vpop.eup %2553  ;;  %v3347_v19 = vld [vmem:[#allocation8 + $0xe8] ss:$16 sps:$4 sm:$0xff]  }
 0x59c   :  { %2563 = vpow2.f32 %v2155_v17  ;;  %v2556_v38 = vpop.eup %2555  ;;  %v3344_v17 = vld [vmem:[#allocation8 + $0xe0] ss:$16 sps:$4 sm:$0xff]  }
 0x59d   :  { %2565 = vrcp.f32 %v1537_v21  ;;  %v2558_v7 = vpop.eup %2557  ;;  %v1562_v60 = vadd.f32 1.0, %v2556_v38 }
 0x59e   :  { %2567 = vrcp.f32 %v1549_v22 }
 0x59f   :  { %2569 = vrcp.f32 %v1562_v60 }
 0x5a4   :  { %v2560_v39 = vpop.eup %2559 }
 0x5a5   :  { %v2562_v40 = vpop.eup %2561  ;;  %v1570_v41 = vmul.f32 %v2560_v39, %v2554_v37 }
 0x5a6   :  { %v2564_v42 = vpop.eup %2563  ;;  %v1568_v58 = vmul.f32 %v2562_v40, %v3197_v52 }
 0x5a7   :  { %v2566_v59 = vpop.eup %2565  ;;  %v1563_v2 = vadd.f32 1.0, %v2564_v42 }
 0x5a8   :  { %v3287_v62 = vadd.f32 %v1570_v41, %v1568_v58  ;;  %v1571_v63 = vmul.f32 %v2566_v59, %v2558_v7  ;;  %v2568_v1 = vpop.eup %2567 }
 0x5a9   :  { %v1569_v3 = vmul.f32 %v2568_v1, %v3201_v36  ;;  %v2570_v5 = vpop.eup %2569  ;;  %v3313_v36 = vld [vmem:[#allocation8 + $0x88] ss:$16 sps:$4 sm:$0xff]  }
 0x5aa   :  { %2571 = vtanh.f32 %v3287_v62 }
 0x5ab   :  { %v3291_v4 = vadd.f32 %v1571_v63, %v1569_v3  ;;  %2573 = vrcp.f32 %v1563_v2 }
 0x5ad   :  { %2575 = vtanh.f32 %v3291_v4 }
 0x5b4   :  { %v2572_v24 = vpop.eup %2571 }
 0x5b5   :  { %v2574_v52 = vpop.eup %2573  ;;  %v1576_v26 = vmul.f32 %v2572_v24, %v2570_v5 }
 0x5b7   :  { %v2576_v25 = vpop.eup %2575 }
 0x5b8   :  { %v1577_v27 = vmul.f32 %v2576_v25, %v2574_v52 }
 0x5ba   :  { %v1587_v28 = vpack.c.bf16 %v1577_v27, %v1576_v26 }
 0x5bc   :  { %1621 = vmatmul.mubr.bf16.vlgmr.msra.gmra.mrb[20].mxu0 %v1587_v28  ;;  %1664 = vmatmul.mubr.bf16.vlgmr.msra.gmra.mrb[20].mxu1 %v1587_v28 }
 0x5bd   :  { %1741 = vmatpush1.bf16.msra.mxu0 %v3204_v44  ;;  %1784 = vmatpush1.bf16.msra.mxu1 %v3207_v35 }
 0x5be   :  { %1742 = vmatprep.subr.bf16.mxu0 %v3210_v45  ;;  %1785 = vmatprep.subr.bf16.mxu1 %v3213_v46 }
 0x5bf   :  { %1772 = vmatprep.mubr.bf16.mxu0 %v2806_v0  ;;  %1815 = vmatprep.mubr.bf16.mxu1 %v2806_v0 }
 0x5c1   :  { %1743 = vmatpush1.bf16.msra.mxu0 %v3218_v47  ;;  %1786 = vmatpush1.bf16.msra.mxu1 %v3221_v48 }
 0x5c2   :  { %1744 = vmatprep.subr.bf16.mxu0 %v3224_v49  ;;  %1787 = vmatprep.subr.bf16.mxu1 %v3227_v33 }
 0x5c5   :  { %1745 = vmatpush1.bf16.msra.mxu0 %v3230_v34  ;;  %1788 = vmatpush1.bf16.msra.mxu1 %v3233_v50 }
 0x5c6   :  { %1746 = vmatprep.subr.bf16.mxu0 %v3236_v51  ;;  %1789 = vmatprep.subr.bf16.mxu1 %v3239_v53 }
 0x5c9   :  { %1747 = vmatpush1.bf16.msra.mxu0 %v3242_v54  ;;  %1790 = vmatpush1.bf16.msra.mxu1 %v3245_v55 }
 0x5ca   :  { %1748 = vmatprep.subr.bf16.mxu0 %v3248_v11  ;;  %1791 = vmatprep.subr.bf16.mxu1 %v3251_v20 }
 0x5cd   :  { %1749 = vmatpush1.bf16.msra.mxu0 %v3254_v23  ;;  %1792 = vmatpush1.bf16.msra.mxu1 %v3313_v36 }
 0x5ce   :  { %1750 = vmatprep.subr.bf16.mxu0 %v3258_v18  ;;  %1793 = vmatprep.subr.bf16.mxu1 %v3317_v29 }
 0x5d1   :  { %1751 = vmatpush1.bf16.msra.mxu0 %v3320_v30  ;;  %1794 = vmatpush1.bf16.msra.mxu1 %v3323_v31 }
 0x5d2   :  { %1752 = vmatprep.subr.bf16.mxu0 %v3326_v43  ;;  %1795 = vmatprep.subr.bf16.mxu1 %v3329_v6 }
 0x5d5   :  { %1753 = vmatpush1.bf16.msra.mxu0 %v3332_v9  ;;  %1796 = vmatpush1.bf16.msra.mxu1 %v3335_v10 }
 0x5d6   :  { %1754 = vmatprep.subr.bf16.mxu0 %v3338_v12  ;;  %1797 = vmatprep.subr.bf16.mxu1 %v3341_v14 }
 0x5d9   :  { %1755 = vmatpush1.bf16.msra.mxu0 %v3344_v17  ;;  %1798 = vmatpush1.bf16.msra.mxu1 %v3347_v19 }
 0x5da   :  { %1892 = vmatprep.subr.bf16.mxu0 %v3272_v56  ;;  %1935 = vmatprep.subr.bf16.mxu1 %v3275_v57 }
 0x68f   :  { %v1622_v13 = vpop.f32.mrb[20].mxu0  ;;  %v1665_v21 = vpop.f32.mrb[20].mxu1 }
 0x690   :  { %v2194_v8 = vadd.f32 %v1622_v13, %v3032_v15  ;;  %v1624_v22 = vpop.f32.mrb[21].mxu0  ;;  %v1667_v37 = vpop.f32.mrb[21].mxu1  ;;  %v2226_v1 = vadd.f32 %v1665_v21, %v3042_v61 }
 0x691   :  { %v2195_v38 = vadd.f32 %v1624_v22, %v3034_v16  ;;  %v1626_v7 = vpop.f32.mrb[22].mxu0  ;;  %v1669_v39 = vpop.f32.mrb[22].mxu1  ;;  %v2227_v63 = vadd.f32 %v1667_v37, %v3039_v32 }
 0x692   :  { %v2156_v40 = vmul.f32 -1.442695, %v2194_v8  ;;  %v2196_v41 = vadd.f32 %v1626_v7, %v3032_v15  ;;  %v1628_v42 = vpop.f32.mrb[23].mxu0  ;;  %v1671_v58 = vpop.f32.mrb[23].mxu1  ;;  %v2228_v5 = vadd.f32 %v1669_v39, %v3042_v61 }
 0x693   :  { %v2158_v59 = vmul.f32 -1.442695, %v2195_v38  ;;  %v2197_v56 = vadd.f32 %v1628_v42, %v3034_v16  ;;  %v2160_v2 = vmul.f32 -1.442695, %v2227_v63  ;;  %v2229_v3 = vadd.f32 %v1671_v58, %v3039_v32 }
 0x694   :  { %2577 = vpow2.f32 %v2156_v40  ;;  %v2157_v57 = vmul.f32 -1.442695, %v2196_v41 }
 0x695   :  { %2579 = vpow2.f32 %v2158_v59  ;;  %v2159_v60 = vmul.f32 -1.442695, %v2197_v56  ;;  %v2161_v26 = vmul.f32 -1.442695, %v2229_v3 }
 0x696   :  { %2581 = vpow2.f32 %v2157_v57 }
 0x697   :  { %2583 = vpow2.f32 %v2159_v60 }
 0x698   :  { %2585 = vtanh.f32 %v2226_v1 }
 0x699   :  { %2587 = vpow2.f32 %v2160_v2 }
 0x69a   :  { %2589 = vtanh.f32 %v2228_v5 }
 0x69e   :  { %v2578_v24 = vpop.eup %2577 }
 0x69f   :  { %v2580_v52 = vpop.eup %2579  ;;  %v1688_v25 = vadd.f32 1.0, %v2578_v24 }
 0x6a0   :  { %v1700_v27 = vadd.f32 1.0, %v2580_v52  ;;  %v2582_v28 = vpop.eup %2581 }
 0x6a1   :  { %2591 = vrcp.f32 %v1688_v25  ;;  %v1689_v13 = vadd.f32 1.0, %v2582_v28  ;;  %v2584_v8 = vpop.eup %2583 }
 0x6a2   :  { %2593 = vrcp.f32 %v1700_v27  ;;  %v1701_v21 = vadd.f32 1.0, %v2584_v8  ;;  %v2586_v22 = vpop.eup %2585 }
 0x6a3   :  { %2595 = vpow2.f32 %v2161_v26  ;;  %v2588_v37 = vpop.eup %2587 }
 0x6a4   :  { %2597 = vrcp.f32 %v1689_v13  ;;  %v2590_v38 = vpop.eup %2589  ;;  %v1714_v59 = vadd.f32 1.0, %v2588_v37 }
 0x6a5   :  { %2599 = vrcp.f32 %v1701_v21 }
 0x6a6   :  { %2601 = vrcp.f32 %v1714_v59 }
 0x6ab   :  { %v2592_v7 = vpop.eup %2591 }
 0x6ac   :  { %v2594_v39 = vpop.eup %2593  ;;  %v1722_v40 = vmul.f32 %v2592_v7, %v2586_v22 }
 0x6ad   :  { %v2596_v41 = vpop.eup %2595  ;;  %v1720_v42 = vmul.f32 %v2594_v39, %v3287_v62 }
 0x6ae   :  { %v2598_v58 = vpop.eup %2597  ;;  %v1715_v63 = vadd.f32 1.0, %v2596_v41 }
 0x6af   :  { %v3361_v56 = vadd.f32 %v1722_v40, %v1720_v42  ;;  %v1723_v57 = vmul.f32 %v2598_v58, %v2590_v38  ;;  %v2600_v60 = vpop.eup %2599 }
 0x6b0   :  { %v1721_v1 = vmul.f32 %v2600_v60, %v3291_v4  ;;  %v2602_v3 = vpop.eup %2601 }
 0x6b1   :  { %2603 = vtanh.f32 %v3361_v56 }
 0x6b2   :  { %v3365_v2 = vadd.f32 %v1723_v57, %v1721_v1  ;;  %2605 = vrcp.f32 %v1715_v63 }
 0x6b4   :  { %2607 = vtanh.f32 %v3365_v2 }
 0x6bb   :  { %v2604_v5 = vpop.eup %2603 }
 0x6bc   :  { %v2606_v62 = vpop.eup %2605  ;;  %v1728_v52 = vmul.f32 %v2604_v5, %v2602_v3 }
 0x6be   :  { %v2608_v24 = vpop.eup %2607 }
 0x6bf   :  { %v1729_v25 = vmul.f32 %v2608_v24, %v2606_v62 }
 0x6c1   :  { %v1739_v26 = vpack.c.bf16 %v1729_v25, %v1728_v52 }
 0x6c3   :  { %1773 = vmatmul.mubr.bf16.vlgmr.msra.gmra.mrb[24].mxu0 %v1739_v26  ;;  %1816 = vmatmul.mubr.bf16.vlgmr.msra.gmra.mrb[24].mxu1 %v1739_v26 }
 0x6c4   :  { %1893 = vmatpush1.bf16.msra.mxu0 %v3204_v44  ;;  %1936 = vmatpush1.bf16.msra.mxu1 %v3207_v35 }
 0x6c5   :  { %1894 = vmatprep.subr.bf16.mxu0 %v3210_v45  ;;  %1937 = vmatprep.subr.bf16.mxu1 %v3213_v46 }
 0x6c6   :  { %1924 = vmatprep.mubr.bf16.mxu0 %v2806_v0  ;;  %1967 = vmatprep.mubr.bf16.mxu1 %v2806_v0 }
 0x6c8   :  { %1895 = vmatpush1.bf16.msra.mxu0 %v3218_v47  ;;  %1938 = vmatpush1.bf16.msra.mxu1 %v3221_v48 }
 0x6c9   :  { %1896 = vmatprep.subr.bf16.mxu0 %v3224_v49  ;;  %1939 = vmatprep.subr.bf16.mxu1 %v3227_v33 }
 0x6cc   :  { %1897 = vmatpush1.bf16.msra.mxu0 %v3230_v34  ;;  %1940 = vmatpush1.bf16.msra.mxu1 %v3233_v50 }
 0x6cd   :  { %1898 = vmatprep.subr.bf16.mxu0 %v3236_v51  ;;  %1941 = vmatprep.subr.bf16.mxu1 %v3239_v53 }
 0x6d0   :  { %1899 = vmatpush1.bf16.msra.mxu0 %v3242_v54  ;;  %1942 = vmatpush1.bf16.msra.mxu1 %v3245_v55 }
 0x6d1   :  { %1900 = vmatprep.subr.bf16.mxu0 %v3248_v11  ;;  %1943 = vmatprep.subr.bf16.mxu1 %v3251_v20 }
 0x6d4   :  { %1901 = vmatpush1.bf16.msra.mxu0 %v3254_v23  ;;  %1944 = vmatpush1.bf16.msra.mxu1 %v3313_v36 }
 0x6d5   :  { %1902 = vmatprep.subr.bf16.mxu0 %v3258_v18  ;;  %1945 = vmatprep.subr.bf16.mxu1 %v3317_v29 }
 0x6d8   :  { %1903 = vmatpush1.bf16.msra.mxu0 %v3320_v30  ;;  %1946 = vmatpush1.bf16.msra.mxu1 %v3323_v31 }
 0x6d9   :  { %1904 = vmatprep.subr.bf16.mxu0 %v3326_v43  ;;  %1947 = vmatprep.subr.bf16.mxu1 %v3329_v6 }
 0x6dc   :  { %1905 = vmatpush1.bf16.msra.mxu0 %v3332_v9  ;;  %1948 = vmatpush1.bf16.msra.mxu1 %v3335_v10 }
 0x6dd   :  { %1906 = vmatprep.subr.bf16.mxu0 %v3338_v12  ;;  %1949 = vmatprep.subr.bf16.mxu1 %v3341_v14 }
 0x6e0   :  { %1907 = vmatpush1.bf16.msra.mxu0 %v3344_v17  ;;  %1950 = vmatpush1.bf16.msra.mxu1 %v3347_v19 }
 0x796   :  { %v1774_v0 = vpop.f32.mrb[24].mxu0  ;;  %v1817_v44 = vpop.f32.mrb[24].mxu1 }
 0x797   :  { %v2198_v35 = vadd.f32 %v1774_v0, %v3032_v15  ;;  %v1776_v45 = vpop.f32.mrb[25].mxu0  ;;  %v1819_v46 = vpop.f32.mrb[25].mxu1  ;;  %v2230_v23 = vadd.f32 %v1817_v44, %v3042_v61 }
 0x798   :  { %v2199_v47 = vadd.f32 %v1776_v45, %v3034_v16  ;;  %v1778_v48 = vpop.f32.mrb[26].mxu0  ;;  %v1821_v49 = vpop.f32.mrb[26].mxu1  ;;  %v2231_v20 = vadd.f32 %v1819_v46, %v3039_v32 }
 0x799   :  { %v2162_v33 = vmul.f32 -1.442695, %v2198_v35  ;;  %v2200_v34 = vadd.f32 %v1778_v48, %v3032_v15  ;;  %v1780_v50 = vpop.f32.mrb[27].mxu0  ;;  %v1823_v51 = vpop.f32.mrb[27].mxu1  ;;  %v2232_v36 = vadd.f32 %v1821_v49, %v3042_v61 }
 0x79a   :  { %v2164_v53 = vmul.f32 -1.442695, %v2199_v47  ;;  %v2201_v54 = vadd.f32 %v1780_v50, %v3034_v16  ;;  %v2166_v18 = vmul.f32 -1.442695, %v2231_v20  ;;  %v2233_v4 = vadd.f32 %v1823_v51, %v3039_v32 }
 0x79b   :  { %2609 = vpow2.f32 %v2162_v33  ;;  %v2163_v55 = vmul.f32 -1.442695, %v2200_v34 }
 0x79c   :  { %2611 = vpow2.f32 %v2164_v53  ;;  %v2165_v11 = vmul.f32 -1.442695, %v2201_v54  ;;  %v2167_v43 = vmul.f32 -1.442695, %v2233_v4 }
 0x79d   :  { %2613 = vpow2.f32 %v2163_v55 }
 0x79e   :  { %2615 = vpow2.f32 %v2165_v11 }
 0x79f   :  { %2617 = vtanh.f32 %v2230_v23 }
 0x7a0   :  { %2619 = vpow2.f32 %v2166_v18 }
 0x7a1   :  { %2621 = vtanh.f32 %v2232_v36 }
 0x7a5   :  { %v2610_v29 = vpop.eup %2609 }
 0x7a6   :  { %v2612_v30 = vpop.eup %2611  ;;  %v1840_v31 = vadd.f32 1.0, %v2610_v29 }
 0x7a7   :  { %v1852_v6 = vadd.f32 1.0, %v2612_v30  ;;  %v2614_v9 = vpop.eup %2613 }
 0x7a8   :  { %2623 = vrcp.f32 %v1840_v31  ;;  %v1841_v10 = vadd.f32 1.0, %v2614_v9  ;;  %v2616_v12 = vpop.eup %2615 }
 0x7a9   :  { %2625 = vrcp.f32 %v1852_v6  ;;  %v1853_v14 = vadd.f32 1.0, %v2616_v12  ;;  %v2618_v17 = vpop.eup %2617 }
 0x7aa   :  { %2627 = vpow2.f32 %v2167_v43  ;;  %v2620_v19 = vpop.eup %2619 }
 0x7ab   :  { %2629 = vrcp.f32 %v1841_v10  ;;  %v2622_v27 = vpop.eup %2621  ;;  %v1866_v38 = vadd.f32 1.0, %v2620_v19 }
 0x7ac   :  { %2631 = vrcp.f32 %v1853_v14 }
 0x7ad   :  { %2633 = vrcp.f32 %v1866_v38 }
 0x7b2   :  { %v2624_v28 = vpop.eup %2623 }
 0x7b3   :  { %v2626_v13 = vpop.eup %2625  ;;  %v1874_v8 = vmul.f32 %v2624_v28, %v2618_v17 }
 0x7b4   :  { %v2628_v21 = vpop.eup %2627  ;;  %v1872_v22 = vmul.f32 %v2626_v13, %v3361_v56 }
 0x7b5   :  { %v2630_v37 = vpop.eup %2629  ;;  %v1867_v41 = vadd.f32 1.0, %v2628_v21 }
 0x7b6   :  { %v3409_v7 = vadd.f32 %v1874_v8, %v1872_v22  ;;  %v1875_v39 = vmul.f32 %v2630_v37, %v2622_v27  ;;  %v2632_v40 = vpop.eup %2631 }
 0x7b7   :  { %v1873_v42 = vmul.f32 %v2632_v40, %v3365_v2  ;;  %v2634_v59 = vpop.eup %2633 }
 0x7b8   :  { %2635 = vtanh.f32 %v3409_v7 }
 0x7b9   :  { %v3413_v58 = vadd.f32 %v1875_v39, %v1873_v42  ;;  %2637 = vrcp.f32 %v1867_v41 }
 0x7bb   :  { %2639 = vtanh.f32 %v3413_v58 }
 0x7c2   :  { %v2636_v57 = vpop.eup %2635 }
 0x7c3   :  { %v2638_v56 = vpop.eup %2637  ;;  %v1880_v63 = vmul.f32 %v2636_v57, %v2634_v59 }
 0x7c5   :  { %v2640_v60 = vpop.eup %2639 }
 0x7c6   :  { %v1881_v1 = vmul.f32 %v2640_v60, %v2638_v56 }
 0x7c8   :  { %v1891_v3 = vpack.c.bf16 %v1881_v1, %v1880_v63 }
 0x7ca   :  { %1925 = vmatmul.mubr.bf16.vlgmr.msra.gmra.mrb[28].mxu0 %v1891_v3  ;;  %1968 = vmatmul.mubr.bf16.vlgmr.msra.gmra.mrb[28].mxu1 %v1891_v3 }
 0x89d   :  { %v1926_v5 = vpop.f32.mrb[28].mxu0  ;;  %v1969_v62 = vpop.f32.mrb[28].mxu1 }
 0x89e   :  { %v2202_v2 = vadd.f32 %v1926_v5, %v3032_v15  ;;  %v1928_v24 = vpop.f32.mrb[29].mxu0  ;;  %v1971_v52 = vpop.f32.mrb[29].mxu1  ;;  %v2234_v50 = vadd.f32 %v1969_v62, %v3042_v61 }
 0x89f   :  { %v2203_v25 = vadd.f32 %v1928_v24, %v3034_v16  ;;  %v1930_v26 = vpop.f32.mrb[30].mxu0  ;;  %v1973_v0 = vpop.f32.mrb[30].mxu1  ;;  %v2235_v34 = vadd.f32 %v1971_v52, %v3039_v32 }
 0x8a0   :  { %v2168_v44 = vmul.f32 -1.442695, %v2202_v2  ;;  %v2204_v35 = vadd.f32 %v1930_v26, %v3032_v15  ;;  %v1932_v45 = vpop.f32.mrb[31].mxu0  ;;  %v1975_v46 = vpop.f32.mrb[31].mxu1  ;;  %v2236_v15 = vadd.f32 %v1973_v0, %v3042_v61 }
 0x8a1   :  { %v2170_v47 = vmul.f32 -1.442695, %v2203_v25  ;;  %v2205_v48 = vadd.f32 %v1932_v45, %v3034_v16  ;;  %v2172_v51 = vmul.f32 -1.442695, %v2235_v34  ;;  %v2237_v53 = vadd.f32 %v1975_v46, %v3039_v32 }
 0x8a2   :  { %2641 = vpow2.f32 %v2168_v44  ;;  %v2169_v49 = vmul.f32 -1.442695, %v2204_v35 }
 0x8a3   :  { %2643 = vpow2.f32 %v2170_v47  ;;  %v2171_v33 = vmul.f32 -1.442695, %v2205_v48  ;;  %v2173_v16 = vmul.f32 -1.442695, %v2237_v53 }
 0x8a4   :  { %2645 = vpow2.f32 %v2169_v49 }
 0x8a5   :  { %2647 = vpow2.f32 %v2171_v33 }
 0x8a6   :  { %2649 = vtanh.f32 %v2234_v50 }
 0x8a7   :  { %2651 = vpow2.f32 %v2172_v51 }
 0x8a8   :  { %2653 = vtanh.f32 %v2236_v15 }
 0x8ac   :  { %v2642_v54 = vpop.eup %2641 }
 0x8ad   :  { %v2644_v55 = vpop.eup %2643  ;;  %v1992_v11 = vadd.f32 1.0, %v2642_v54 }
 0x8ae   :  { %v2004_v20 = vadd.f32 1.0, %v2644_v55  ;;  %v2646_v23 = vpop.eup %2645 }
 0x8af   :  { %2655 = vrcp.f32 %v1992_v11  ;;  %v1993_v18 = vadd.f32 1.0, %v2646_v23  ;;  %v2648_v4 = vpop.eup %2647 }
 0x8b0   :  { %2657 = vrcp.f32 %v2004_v20  ;;  %v2005_v36 = vadd.f32 1.0, %v2648_v4  ;;  %v2650_v32 = vpop.eup %2649 }
 0x8b1   :  { %2659 = vpow2.f32 %v2173_v16  ;;  %v2652_v29 = vpop.eup %2651 }
 0x8b2   :  { %2661 = vrcp.f32 %v1993_v18  ;;  %v2654_v61 = vpop.eup %2653  ;;  %v2018_v6 = vadd.f32 1.0, %v2652_v29 }
 0x8b3   :  { %2663 = vrcp.f32 %v2005_v36 }
 0x8b4   :  { %2665 = vrcp.f32 %v2018_v6 }
 0x8b9   :  { %v2656_v30 = vpop.eup %2655 }
 0x8ba   :  { %v2658_v31 = vpop.eup %2657  ;;  %v2026_v43 = vmul.f32 %v2656_v30, %v2650_v32 }
 0x8bb   :  { %v2660_v9 = vpop.eup %2659  ;;  %v2024_v10 = vmul.f32 %v2658_v31, %v3409_v7 }
 0x8bc   :  { %v2662_v12 = vpop.eup %2661  ;;  %v2019_v27 = vadd.f32 1.0, %v2660_v9 }
 0x8bd   :  { %v2028_v14 = vadd.f32 %v2026_v43, %v2024_v10  ;;  %v2027_v17 = vmul.f32 %v2662_v12, %v2654_v61  ;;  %v2664_v19 = vpop.eup %2663 }
 0x8be   :  { %v2025_v28 = vmul.f32 %v2664_v19, %v3413_v58  ;;  %v2666_v8 = vpop.eup %2665 }
 0x8bf   :  { %2667 = vtanh.f32 %v2028_v14 }
 0x8c0   :  { %v2029_v13 = vadd.f32 %v2027_v17, %v2025_v28  ;;  %2669 = vrcp.f32 %v2019_v27 }
 0x8c2   :  { %2671 = vtanh.f32 %v2029_v13 }
 0x8c9   :  { %v2668_v21 = vpop.eup %2667 }
 0x8ca   :  { %v2032_v22 = vmul.f32 %v2668_v21, %v2666_v8  ;;  %v2670_v37 = vpop.eup %2669 }
 0x8cc   :  { %2034 = vst [vmem:[#allocation9] sm:$0xff] %v2032_v22  ;;  %v2672_v38 = vpop.eup %2671 }
 0x8cd   :  { %v2033_v7 = vmul.f32 %v2672_v38, %v2670_v37 }
 0x8cf   :  { %2035 = vst [vmem:[#allocation9 + $0x8] sm:$0xff] %v2033_v7 }
 0x8d0   :  { %2782 = shalt.err (!%p2779_p0)
}
 0x8d1   :  { %s2783_s6 = scalar_lea.hbm %s3442_s4, 256 }
 0x8d2   :  { %p2784_p1 = scmp.ne.s32.totalorder %s3442_s4, %s2783_s6  ;;  %p2787_p2 = scmp.lt.u32.totalorder %s2783_s6, %s3442_s4 }
 0x8d4   :  { %p2789_p3 = pnand %p2787_p2, %p2784_p1 }
 0x8d6   :  { %2792 = shalt.err (!%p2789_p3)
}
 0x8d7   :  { %s2808_s11 = smov 128   ;;  %s2809_s12 = smov 8  }
 0x8d8   :  { %2047 = dma.vmem_to_hbm [thread:$0]  %s2042_s26, 256, %s3442_s4, [#allocation5], %s2808_s11, %s2808_s11, %s2809_s12  }
 0x8d9   :  { %2797 = dma.done.wait [#allocation5], 256  }
 0x8da   :  { %2798 = vsyncadd [#allocation5], 4294967040 }
 0x8db   :  { %2051 = vsyncpa [#allocation4], 1 }
 0x8dc   :  { %2052 = vsyncpa [#allocation7], 1 }
 0x8dd   :  { %2053 = vsyncpa [#allocation5], 1 }

</bundles_post_ra>
